<compile_context>
chip_gen: v7x
topology: tpu7x:2x2x1
jax: 0.10.0
libtpu: 0.0.40
codegen_flags: <defaults>
</compile_context>

<pallas_src>
import jax
import jax.numpy as jnp
import numpy as np
from jax import lax
from jax.experimental import pallas as pl
from jax.experimental.pallas import tpu as pltpu

EPS = 1e-5
LANES = 128  # lane padding for the MXU output / VPU math (VMEM-only, never HBM)


def _round_up(x, m):
    return (x + m - 1) // m * m


def _pick_ho_tile(Ho, Wo, CPAD, budget_bytes=4 * 1024 * 1024):
    """Largest divisor of Ho whose f32 conv tile [Ho_t*Wo, CPAD] fits budget."""
    best = 1
    for t in range(1, Ho + 1):
        if Ho % t == 0 and t * Wo * CPAD * 4 <= budget_bytes:
            best = t
    return best


def _conv_tile(x_ref, w_ref, *, k, stride, ho_t, Wo, Cin, num_hb):
    """f32 conv rows [ho_t*Wo, CPAD] for row-chunk pl.program_id(1) of the image.

    x_ref: [Hp, Wp, Cin] bf16 (whole padded image, resident per n)
    w_ref: [k*k*Cin, CPAD] bf16 (resident)
    """
    if num_hb == 1:
        xr = x_ref[...]                                      # [Hp, Wp, Cin]
    else:
        rows_in = (ho_t - 1) * stride + k
        row0 = pl.multiple_of(pl.program_id(1) * (ho_t * stride), ho_t * stride)
        xr = x_ref[pl.ds(row0, rows_in), :, :]               # [rows_in, Wp, Cin]

    # k*k shifted windows of the VMEM-resident image (no HBM im2col), stacked
    # along the lane axis, then contracted in ONE matmul (K = k*k*Cin).
    wins = []
    for t in range(k * k):
        kh, kw = divmod(t, k)
        wins.append(
            lax.slice(
                xr,
                (kh, kw, 0),
                (kh + (ho_t - 1) * stride + 1, kw + (Wo - 1) * stride + 1, Cin),
                (stride, stride, 1),
            )                                                # [ho_t, Wo, Cin]
        )
    patch = jnp.concatenate(wins, axis=-1).reshape(ho_t * Wo, k * k * Cin)
    return jnp.dot(patch, w_ref[...], preferred_element_type=jnp.float32)


# ---------- Pass 1: stats only (per-chunk mean / M2 Welford partials) ----------

def _make_stats_kernel(k, stride, ho_t, Wo, Cin, num_hb):
    inv_cnt = 1.0 / float(ho_t * Wo)

    def kernel(x_ref, w_ref, stats_ref):
        conv = _conv_tile(x_ref, w_ref, k=k, stride=stride, ho_t=ho_t,
                          Wo=Wo, Cin=Cin, num_hb=num_hb)     # [rows, CPAD] f32
        cmean = jnp.sum(conv, axis=0, keepdims=True) * inv_cnt   # [1, CPAD]
        d = conv - cmean
        cm2 = jnp.sum(d * d, axis=0, keepdims=True)              # [1, CPAD]
        stats_ref[0:1, :] = cmean                                  # direct row writes
        stats_ref[1:2, :] = cm2

    return kernel


# ---------- Pass 2: recompute conv tile, fused  relu(conv * s + t) ----------

def _make_apply_kernel(k, stride, ho_t, Wo, Cin, Cout, num_hb):
    def kernel(x_ref, w_ref, s_ref, t_ref, out_ref):
        conv = _conv_tile(x_ref, w_ref, k=k, stride=stride, ho_t=ho_t,
                          Wo=Wo, Cin=Cin, num_hb=num_hb)     # [rows, CPAD] f32
        y = jnp.maximum(conv * s_ref[...] + t_ref[...], 0.0)
        # Only the real Cout channels ever reach HBM (no padded-lane traffic).
        # TODO(synk): for fully lane-dense stores, pack as [N*Ho, Wo*Cout]
        # (needs a minor-dim relayout inside the kernel).
        out_ref[...] = y[:, :Cout]

    return kernel


def conv_block_forward(x_nchw, weight, bias, gamma, beta, *, stride=1, padding=0):
    """ConvBlock forward.  x_nchw: [N, Cin, H, W]; weight: [Cout, Cin, k, k].

    `bias` is accepted for nn.Conv2d interface parity but unused: under
    train-mode BatchNorm a constant per-channel shift is removed exactly by
    the batch mean and does not change the variance.
    """
    del bias
    N, Cin, H, W = x_nchw.shape
    Cout, _, k, _ = weight.shape
    Ho = (H + 2 * padding - k) // stride + 1
    Wo = (W + 2 * padding - k) // stride + 1
    CPAD = _round_up(Cout, LANES)
    Hp, Wp = H + 2 * padding, W + 2 * padding

    ho_t = _pick_ho_tile(Ho, Wo, CPAD)
    HB = Ho // ho_t
    rows = ho_t * Wo
    M = N * Ho * Wo

    # NCHW -> NHWC, spatial zero-pad, bf16 MXU inputs (accumulation stays f32).
    # TODO(synk): accept/return NHWC (ideally with (W, C) folded into lanes)
    # end-to-end to drop these layout passes and the lane-sparse image block.
    x_nhwc = jnp.transpose(x_nchw, (0, 2, 3, 1))
    x_pad = jnp.pad(
        x_nhwc, ((0, 0), (padding, padding), (padding, padding), (0, 0))
    ).astype(jnp.bfloat16)

    # [Cout, Cin, kh, kw] -> [k*k*Cin, CPAD] (zero lane padding), bf16.
    w2 = jnp.transpose(weight, (2, 3, 1, 0)).reshape(k * k * Cin, Cout)
    w2 = jnp.pad(w2, ((0, 0), (0, CPAD - Cout))).astype(jnp.bfloat16)

    cparams = pltpu.CompilerParams(
        dimension_semantics=("parallel", "arbitrary"),
        vmem_limit_bytes=32 * 1024 * 1024,
    )

    conv_flops = 2 * M * (k * k * Cin) * CPAD
    x_bytes = int(x_pad.size) * 2
    w_bytes = int(w2.size) * 2

    x_spec = pl.BlockSpec((None, Hp, Wp, Cin), lambda n, hb: (n, 0, 0, 0))
    w_spec = pl.BlockSpec((k * k * Cin, CPAD), lambda n, hb: (0, 0))

    # ---- Pass 1: per-chunk (mean, M2) partials only; no conv written to HBM ----
    stats = pl.pallas_call(
        _make_stats_kernel(k, stride, ho_t, Wo, Cin, HB),
        out_shape=jax.ShapeDtypeStruct((N, HB, 2, CPAD), jnp.float32),
        grid_spec=pltpu.PrefetchScalarGridSpec(
            num_scalar_prefetch=0,
            grid=(N, HB),
            in_specs=[x_spec, w_spec],
            out_specs=pl.BlockSpec((None, None, 2, CPAD),
                                   lambda n, hb: (n, hb, 0, 0)),
        ),
        compiler_params=cparams,
        cost_estimate=pl.CostEstimate(
            flops=conv_flops, transcendentals=0,
            bytes_accessed=x_bytes + w_bytes + N * HB * 2 * CPAD * 4),
    )(x_pad, w2)

    # ---- Global BN statistics: Welford merge of equal-size chunks ----
    cnt = float(rows)
    ch_mean = stats[:, :, 0, :Cout].reshape(N * HB, Cout)
    ch_m2 = stats[:, :, 1, :Cout].reshape(N * HB, Cout)
    mean = jnp.mean(ch_mean, axis=0)                               # [Cout]
    m2 = jnp.sum(ch_m2, axis=0) + cnt * jnp.sum((ch_mean - mean) ** 2, axis=0)
    var = m2 / float(M)                           # biased var, as in BN training
    s = gamma.astype(jnp.float32) * lax.rsqrt(var + EPS)
    t = beta.astype(jnp.float32) - mean * s
    s2 = jnp.pad(s, (0, CPAD - Cout)).reshape(1, CPAD)
    t2 = jnp.pad(t, (0, CPAD - Cout)).reshape(1, CPAD)

    # ---- Pass 2: recompute conv tile, apply relu(conv*s + t), store Cout only ----
    out = pl.pallas_call(
        _make_apply_kernel(k, stride, ho_t, Wo, Cin, Cout, HB),
        out_shape=jax.ShapeDtypeStruct((N, HB, rows, Cout), jnp.float32),
        grid_spec=pltpu.PrefetchScalarGridSpec(
            num_scalar_prefetch=0,
            grid=(N, HB),
            in_specs=[
                x_spec,
                w_spec,
                pl.BlockSpec((1, CPAD), lambda n, hb: (0, 0)),
                pl.BlockSpec((1, CPAD), lambda n, hb: (0, 0)),
            ],
            out_specs=pl.BlockSpec((None, None, rows, Cout),
                                   lambda n, hb: (n, hb, 0, 0)),
        ),
        compiler_params=cparams,
        cost_estimate=pl.CostEstimate(
            flops=conv_flops + 2 * M * CPAD, transcendentals=0,
            bytes_accessed=x_bytes + w_bytes + M * Cout * 4),
    )(x_pad, w2, s2, t2)

    out_nhwc = out.reshape(N, Ho, Wo, Cout)
    return jnp.transpose(out_nhwc, (0, 3, 1, 2))                   # back to NCHW


def _reference(x_nchw, weight, bias, gamma, beta, *, stride, padding):
    """Pure-JAX reference reproducing the PyTorch forward (train-mode BN)."""
    conv = lax.conv_general_dilated(
        x_nchw.astype(jnp.float32), weight.astype(jnp.float32),
        window_strides=(stride, stride),
        padding=[(padding, padding), (padding, padding)],
        dimension_numbers=("NCHW", "OIHW", "NCHW"),
    ) + bias.reshape(1, -1, 1, 1)
    mean = jnp.mean(conv, axis=(0, 2, 3), keepdims=True)
    var = jnp.mean((conv - mean) ** 2, axis=(0, 2, 3), keepdims=True)
    y = (conv - mean) * lax.rsqrt(var + EPS)
    y = y * gamma.reshape(1, -1, 1, 1) + beta.reshape(1, -1, 1, 1)
    return jnp.maximum(y, 0.0)


if __name__ == "__main__":
    # ConvBlock(in_channels=4, out_channels=8, kernel_size=3, stride=1, padding=1)
    N, Cin, H, W = 2, 4, 16, 16
    Cout, ksz, stride, padding = 8, 3, 1, 1

    key = jax.random.PRNGKey(0)
    kx, kw, kb, kg, kbe = jax.random.split(key, 5)

    x = jax.random.normal(kx, (N, Cin, H, W), dtype=jnp.float32)
    weight = jax.random.normal(kw, (Cout, Cin, ksz, ksz), dtype=jnp.float32) * 0.1
    bias = jax.random.normal(kb, (Cout,), dtype=jnp.float32) * 0.1
    gamma = 1.0 + 0.1 * jax.random.normal(kg, (Cout,), dtype=jnp.float32)
    beta = 0.1 * jax.random.normal(kbe, (Cout,), dtype=jnp.float32)

    out = conv_block_forward(x, weight, bias, gamma, beta,
                             stride=stride, padding=padding)
    out = jax.block_until_ready(out)

    ref = jax.block_until_ready(
        _reference(x, weight, bias, gamma, beta, stride=stride, padding=padding))

    assert out.shape == (N, Cout, H, W), out.shape
    # bf16 MXU inputs (f32 accumulation) -> slightly looser tolerance than pure f32.
    np.testing.assert_allclose(np.asarray(out), np.asarray(ref), rtol=2e-2, atol=2e-2)

    print("KERNEL_OK")
</pallas_src>

<mosaic_0001>
module attributes {stable_mosaic.version = 11 : i64} {
  func.func @kernel(%arg0: i32, %arg1: i32, %arg2: memref<1x18x18x4xbf16, #tpu.memory_space<vmem>>, %arg3: memref<36x128xbf16, #tpu.memory_space<vmem>>, %arg4: memref<1x1x2x128xf32, #tpu.memory_space<vmem>>) attributes {dimension_semantics = [#tpu.dimension_semantics<parallel>, #tpu.dimension_semantics<arbitrary>], iteration_bounds = array<i64: 2, 1>, scalar_prefetch = 0 : i64, scratch_operands = 0 : i64, tpu.core_type = #tpu.core_type<tc>, window_params = [{transform_indices = @transform_0, window_bounds = array<i64: 1, 18, 18, 4>}, {pipeline_mode = #tpu.pipeline_mode<synchronous>, transform_indices = @transform_1, window_bounds = array<i64: 36, 128>}, {transform_indices = @transform_2, window_bounds = array<i64: 1, 1, 2, 128>}]} {
    %c0 = arith.constant 0 : index
    %c0_0 = arith.constant 0 : index
    %c0_1 = arith.constant 0 : index
    %c0_2 = arith.constant 0 : index
    %0 = vector.load %arg2[%c0, %c0_0, %c0_1, %c0_2] : memref<1x18x18x4xbf16, #tpu.memory_space<vmem>>, vector<1x18x18x4xbf16>
    %1 = vector.shape_cast %0 : vector<1x18x18x4xbf16> to vector<18x18x4xbf16>
    %2 = vector.extract_strided_slice %1 {offsets = [0, 0, 0], sizes = [16, 16, 4], strides = [1, 1, 1]} : vector<18x18x4xbf16> to vector<16x16x4xbf16>
    %3 = vector.extract_strided_slice %1 {offsets = [0, 1, 0], sizes = [16, 16, 4], strides = [1, 1, 1]} : vector<18x18x4xbf16> to vector<16x16x4xbf16>
    %4 = vector.extract_strided_slice %1 {offsets = [0, 2, 0], sizes = [16, 16, 4], strides = [1, 1, 1]} : vector<18x18x4xbf16> to vector<16x16x4xbf16>
    %5 = vector.extract_strided_slice %1 {offsets = [1, 0, 0], sizes = [16, 16, 4], strides = [1, 1, 1]} : vector<18x18x4xbf16> to vector<16x16x4xbf16>
    %6 = vector.extract_strided_slice %1 {offsets = [1, 1, 0], sizes = [16, 16, 4], strides = [1, 1, 1]} : vector<18x18x4xbf16> to vector<16x16x4xbf16>
    %7 = vector.extract_strided_slice %1 {offsets = [1, 2, 0], sizes = [16, 16, 4], strides = [1, 1, 1]} : vector<18x18x4xbf16> to vector<16x16x4xbf16>
    %8 = vector.extract_strided_slice %1 {offsets = [2, 0, 0], sizes = [16, 16, 4], strides = [1, 1, 1]} : vector<18x18x4xbf16> to vector<16x16x4xbf16>
    %9 = vector.extract_strided_slice %1 {offsets = [2, 1, 0], sizes = [16, 16, 4], strides = [1, 1, 1]} : vector<18x18x4xbf16> to vector<16x16x4xbf16>
    %10 = vector.extract_strided_slice %1 {offsets = [2, 2, 0], sizes = [16, 16, 4], strides = [1, 1, 1]} : vector<18x18x4xbf16> to vector<16x16x4xbf16>
    %11 = tpu.concatenate %2, %3, %4, %5, %6, %7, %8, %9, %10 in 2 : vector<16x16x4xbf16>, vector<16x16x4xbf16>, vector<16x16x4xbf16>, vector<16x16x4xbf16>, vector<16x16x4xbf16>, vector<16x16x4xbf16>, vector<16x16x4xbf16>, vector<16x16x4xbf16>, vector<16x16x4xbf16> -> vector<16x16x36xbf16>
    %12 = vector.shape_cast %11 : vector<16x16x36xbf16> to vector<256x36xbf16>
    %c0_3 = arith.constant 0 : index
    %c0_4 = arith.constant 0 : index
    %13 = vector.load %arg3[%c0_3, %c0_4] : memref<36x128xbf16, #tpu.memory_space<vmem>>, vector<36x128xbf16>
    %cst = arith.constant dense<0.000000e+00> : vector<256x128xf32>
    %14 = tpu.matmul %12, %13, %cst {dimension_numbers = #tpu.dot_dimension_numbers<[1], [0], [0], [1], [0, 0, 1, 1], [], []>} : vector<256x36xbf16>, vector<36x128xbf16>, vector<256x128xf32> -> vector<256x128xf32>
    %cst_5 = arith.constant dense<0.000000e+00> : vector<128xf32>
    %15 = vector.multi_reduction <add>, %14, %cst_5 [0] : vector<256x128xf32> to vector<128xf32>
    %16 = vector.shape_cast %15 : vector<128xf32> to vector<1x128xf32>
    %cst_6 = arith.constant 3.906250e-03 : f32
    %17 = vector.broadcast %cst_6 : f32 to vector<1x128xf32>
    %18 = arith.mulf %16, %17 : vector<1x128xf32>
    %19 = vector.broadcast %18 : vector<1x128xf32> to vector<256x128xf32>
    %20 = arith.subf %14, %19 : vector<256x128xf32>
    %21 = arith.mulf %20, %20 : vector<256x128xf32>
    %cst_7 = arith.constant dense<0.000000e+00> : vector<128xf32>
    %22 = vector.multi_reduction <add>, %21, %cst_7 [0] : vector<256x128xf32> to vector<128xf32>
    %23 = vector.shape_cast %22 : vector<128xf32> to vector<1x128xf32>
    %c0_8 = arith.constant 0 : index
    %c0_9 = arith.constant 0 : index
    %c0_10 = arith.constant 0 : index
    %c0_11 = arith.constant 0 : index
    %24 = vector.load %arg4[%c0_8, %c0_9, %c0_10, %c0_11] : memref<1x1x2x128xf32, #tpu.memory_space<vmem>>, vector<1x1x1x128xf32>
    %25 = vector.shape_cast %24 : vector<1x1x1x128xf32> to vector<1x128xf32>
    %26 = vector.shape_cast %18 : vector<1x128xf32> to vector<1x1x1x128xf32>
    tpu.vector_store %arg4[%c0_8, %c0_9, %c0_10, %c0_11], %26 {strides = array<i32>} : memref<1x1x2x128xf32, #tpu.memory_space<vmem>>, vector<1x1x1x128xf32>,
    %c0_12 = arith.constant 0 : index
    %c0_13 = arith.constant 0 : index
    %c1 = arith.constant 1 : index
    %c0_14 = arith.constant 0 : index
    %27 = vector.load %arg4[%c0_12, %c0_13, %c1, %c0_14] : memref<1x1x2x128xf32, #tpu.memory_space<vmem>>, vector<1x1x1x128xf32>
    %28 = vector.shape_cast %27 : vector<1x1x1x128xf32> to vector<1x128xf32>
    %29 = vector.shape_cast %23 : vector<1x128xf32> to vector<1x1x1x128xf32>
    tpu.vector_store %arg4[%c0_12, %c0_13, %c1, %c0_14], %29 {strides = array<i32>} : memref<1x1x2x128xf32, #tpu.memory_space<vmem>>, vector<1x1x1x128xf32>,
    return
  }
  func.func @transform_0(%arg0: i32, %arg1: i32) -> (i32, i32, i32, i32) {
    %c0_i32 = arith.constant 0 : i32
    %c0_i32_0 = arith.constant 0 : i32
    %c0_i32_1 = arith.constant 0 : i32
    %c0_i32_2 = arith.constant 0 : i32
    return %arg0, %c0_i32, %c0_i32_0, %c0_i32_1 : i32, i32, i32, i32
  }
  func.func @transform_1(%arg0: i32, %arg1: i32) -> (i32, i32) {
    %c0_i32 = arith.constant 0 : i32
    %c0_i32_0 = arith.constant 0 : i32
    %c0_i32_1 = arith.constant 0 : i32
    return %c0_i32, %c0_i32_0 : i32, i32
  }
  func.func @transform_2(%arg0: i32, %arg1: i32) -> (i32, i32, i32, i32) {
    %c0_i32 = arith.constant 0 : i32
    %c0_i32_0 = arith.constant 0 : i32
    %c0_i32_1 = arith.constant 0 : i32
    return %arg0, %arg1, %c0_i32, %c0_i32_0 : i32, i32, i32, i32
  }
}

</mosaic_0001>

<bundles_post_ra>
// kernel: tpu_custom_call.1
= control target key start
LH: loop header
LB: loop body
LE: loop exit
PB: predicated region body
PF: predicated region fallthrough
CT: control target
= control target key end

     0   :  { %7 = vsyncpa [#allocation3], 0  ;;  %s2591_s0 = inlined_call_operand.vmem [shape: bf16[2,18,18,4], index: 0, kind: input, shape index: {}]   ;;  %s2592_s1 = inlined_call_operand.vmem [shape: bf16[36,128], index: 1, kind: input, shape index: {}]   ;;  %s2593_s2 = inlined_call_operand.hbm [shape: f32[2,1,2,128], index: 2, kind: output, shape index: {}]  }
   0x1   :  { %9 = vsyncpa [#allocation3 + $0x1], 0  ;;  %s1927_s9 = smov 0   ;;  %s1929_s10 = smov 0  }
   0x2   :  { %s1931_s11 = smov 0   ;;  %s1933_s12 = smov 0  }
   0x3   :  { %s1935_s13 = smov 0   ;;  %s1937_s14 = smov 0  }
   0x4 LB: > { %s1589_s15 = sadd.s32 4294967295, %s1901_s14   ;;  %s1590_s16 = sadd.s32 4294967294, %s1901_s14   ;;  %s1901_s14 = sphi %s1937_s14, %s15_s14   ;;  %s1897_s13 = sphi %s1935_s13, %s2600_s13   ;;  %s1893_s12 = sphi %s1933_s12, %s2599_s12   ;;  %s1889_s11 = sphi %s1931_s11, %s2598_s11   ;;  %s1885_s10 = sphi %s1929_s10, %s2597_s10   ;;  %s1881_s9 = sphi %s1927_s9, %s2596_s9  }
   0x5   : > { %s27_s17 = sadd.s32 1, %s1897_s13  ;;  %s83_s18 = sadd.s32 1, %s1889_s11 }
   0x6   : > { %p29_p0 = scmp.ge.s32.totalorder %s27_s17, 2  ;;  %p93_p1 = scmp.ne.s32.totalorder %s1889_s11, %s1885_s10 }
   0x7   : > { %p94_p2 = scmp.eq.s32.totalorder %s1589_s15, 1  ;;  %p99_p3 = scmp.ne.s32.totalorder %s1885_s10, %s1881_s9 }
   0x8   : > { %s2602_s17 = smov (%p29_p0, %s27_s17), 0  ;;  %p100_p5 = scmp.eq.s32.totalorder %s1590_s16, 1 }
   0x9   : > { %p1967_p4 = por %p94_p2, %p93_p1  ;;  %s78_s20 = ssub.s32 %s1897_s13, %s2602_s17 }
   0xa   : > { %p1593_p6 = scmp.ge.s32.totalorder %s1901_s14, 1  ;;  %p81_p7 = scmp.eq.s32.totalorder %s78_s20, 0 }
   0xb   : > { %p1974_p8 = por %p100_p5, %p99_p3  ;;  %p129_p9 = scmp.lt.s32.totalorder %s1901_s14, 3 }
   0xc   : > { %s1980_s22 = scalar_select %p81_p7, %s1889_s11, %s83_s18  }
   0xd   : > { %p130_p10 = pnand %p1593_p6, %p129_p9 }
   0xe   : > { %p151_p11 = scmp.lt.s32.totalorder (!%p130_p10), %s1893_s12, 1  ;;  %vm564_vm0 = vcmask (!%p130_p10), 1046528   ;;  %s1903_s28 = smov (!%p130_p10), 12   ;;  %vm339_vm1 = vsmask.f32 (!%p130_p10), 7424  ;;  %v1804_v44 = vld [vmem:[%s2592_s1] sm:$0xff] (!%p130_p10)  }
   0xf   : > { %133 = sbr.rel (%p130_p10) target bundleno = 730 (0x2da), region = 28  ;;  %s1904_s29 = smov (!%p130_p10), 20   ;;  %1674 = vmatprep.subr.bf16.mxu0 (!%p130_p10), %v1804_v44  ;;  %v1806_v46 = vld [vmem:[%s2592_s1 + $0x8] sm:$0xff] (!%p130_p10)   ;;  %1712 = vmatprep.subr.bf16.mxu1 (!%p130_p10), %v1804_v44  ;;  %v1808_v50 = vld [vmem:[%s2592_s1 + $0x10] ss:$0 sps:$4 sm:$0x33] (!%p130_p10)  }
  0x10   : > { %s1905_s30 = smov (!%p130_p10), 8   ;;  %s1906_s3 = smov (!%p130_p10), 4   ;;  %1675 = vmatpush3.bf16.msra.mxu0 (!%p130_p10), %v1804_v44  ;;  %1715 = vmatpush3.bf16.msra.mxu1 (!%p130_p10), %v1804_v44  ;;  %vm1200_vm2 = vcmask (!%p130_p10), 1041408   ;;  %vm883_vm3 = vcmask (!%p130_p10), 31744   ;;  %vm916_vm4 = vcmask (!%p130_p10), 64512   ;;  %vm949_vm5 = vcmask (!%p130_p10), 97280  }
  0x11   : > { %s1907_s4 = smov (!%p130_p10), 16   ;;  %s1908_s7 = smov (!%p130_p10), 24   ;;  %1676 = vmatprep.subr.bf16.mxu0 (!%p130_p10), %v1806_v46  ;;  %1713 = vmatprep.subr.bf16.mxu1 (!%p130_p10), %v1806_v46  ;;  %v1202_v54 = vsel (!%p130_p10), %vm1200_vm2, %v1808_v50, 0  ;;  %vm982_vm6 = vcmask (!%p130_p10), 130048   ;;  %vm1015_vm7 = vcmask (!%p130_p10), 162816   ;;  %vm1048_vm8 = vcmask (!%p130_p10), 195584  }
  0x12   : > { %s1909_s16 = smov (!%p130_p10), 28   ;;  %vm1081_vm9 = vcmask (!%p130_p10), 228352   ;;  %vm1114_vm10 = vcmask (!%p130_p10), 261120   ;;  %vm1167_vm11 = vcmask (!%p130_p10), 293888  }
  0x14   : > { %1677 = vmatpush3.bf16.msra.mxu0 (!%p130_p10), %v1806_v46  ;;  %1716 = vmatpush3.bf16.msra.mxu1 (!%p130_p10), %v1806_v46 }
  0x15   : > { %1718 = vmatprep.subr.msk.bf16.mxu0 (!%p130_p10), %vm1200_vm2, %v1808_v50  ;;  %1719 = vmatprep.subr.msk.bf16.mxu1 (!%p130_p10), %vm1200_vm2, %v1808_v50 }
  0x16   : > { %s152_s23 = scalar_select %p151_p11, %s1893_s12, 1 }
  0x18   : > { %s1720_s24 = smul.u32 216, %s152_s23  ;;  %s1910_s23 = smov 32   ;;  %1679 = vmatpush3.bf16.msra.mxu0 %v1202_v54  ;;  %1717 = vmatpush3.bf16.msra.mxu1 %v1202_v54 }
  0x1a   : > { %s1987_s27 = scalar_lea.vmem %s2591_s0, %s1720_s24  ;;  %s148_s24 = sand.u32 1, %s1885_s10  }
  0x1b   : > { %v1990_v0 = vld [vmem:[%s1987_s27 + $0x18] sm:$0xff]   ;;  %v1993_v1 = vld [vmem:[%s1987_s27 + $0xc] sm:$0xff]   ;;  %v1786_v2 = vld [vmem:[%s1987_s27 + $0x14] ss:$0 sps:$4 sm:$0x11]   ;;  %s1594_s25 = sshll.u32 %s148_s24, 1 }
  0x1c   : > { %652 = vrot.lane.b32.xlu1 %v1990_v0, %s1903_s28  ;;  %v1999_v3 = vld [vmem:[%s1987_s27] sm:$0xff]   ;;  %650 = vrot.lane.b32.xlu0 %v1993_v1, %s1903_s28  ;;  %v568_v4 = vrot.slane %v1993_v1, 1  ;;  %v569_v5 = vrot.slane %v1786_v2, 1  ;;  %v1788_v6 = vld [vmem:[%s1987_s27 + $0x8] ss:$0 sps:$4 sm:$0x11]  }
  0x1d   : > { %v565_v7 = vrot.slane %v1999_v3, 1  ;;  %v341_v8 = vshrl.u32 %v1999_v3, 16  ;;  %v343_v9 = vshll.u32 %v1999_v3, 16  ;;  %v353_v10 = vshrl.u32 %v1993_v1, 16  ;;  %v2019_v30 = vld [vmem:[%s1987_s27 + $0x24] sm:$0xff]   ;;  %v2049_v49 = vld [vmem:[%s1987_s27 + $0x30] sm:$0xff]  }
  0x1e   : > { %v570_v11 = vsel %vm564_vm0, %v568_v4, %v569_v5  ;;  %v566_v12 = vrot.slane %v1788_v6, 1  ;;  %v348_v13 = vshll.u32 %v1788_v6, 16  ;;  %v1789_v14 = vld [vmem:[%s1987_s27 + $0x20] ss:$0 sps:$4 sm:$0x11]   ;;  %v355_v15 = vshll.u32 %v1993_v1, 16 }
  0x1f   : > { %v345_v16 = vrot.slane %v343_v9, 1  ;;  %v360_v17 = vshll.u32 %v1786_v2, 16  ;;  %v367_v18 = vshll.u32 %v1990_v0, 16  ;;  %v571_v23 = vrot.slane %v1990_v0, 1  ;;  %v2065_v60 = vld [vmem:[%s1987_s27 + $0x3c] sm:$0xff]   ;;  %s2523_s26 = scalar_lea.vmem [#allocation2], %s1594_s25 }
  0x20   : > { %732 = vrot.lane.b32.xlu0 %v570_v11, %s1904_s29  ;;  %v567_v19 = vsel %vm564_vm0, %v565_v7, %v566_v12  ;;  %v350_v20 = vrot.slane %v348_v13, 1  ;;  %v357_v21 = vrot.slane %v355_v15, 1  ;;  %v365_v25 = vshrl.u32 %v1990_v0, 16  ;;  %v1791_v33 = vld [vmem:[%s1987_s27 + $0x2c] ss:$0 sps:$4 sm:$0x11]  }
  0x21   : > { %613 = vrot.lane.b32.xlu1 %v567_v19, %s1905_s30  ;;  %v346_v22 = vor.u32 %v345_v16, %v341_v8  ;;  %v362_v24 = vrot.slane %v360_v17, 1  ;;  %v572_v26 = vrot.slane %v1789_v14, 1  ;;  %v369_v28 = vrot.slane %v367_v18, 1  ;;  %v1793_v51 = vld [vmem:[%s1987_s27 + $0x38] ss:$0 sps:$4 sm:$0x11]  }
  0x22   : > { %v358_v27 = vor.u32 %v357_v21, %v353_v10  ;;  %v372_v29 = vshll.u32 %v1789_v14, 16  ;;  %v379_v37 = vshll.u32 %v2019_v30, 16  ;;  %v377_v39 = vshrl.u32 %v2019_v30, 16  ;;  %v1795_v2 = vld [vmem:[%s1987_s27 + $0x44] ss:$0 sps:$4 sm:$0x11]  }
  0x23   : > { %v351_v31 = vsel %vm339_vm1, %v346_v22, %v350_v20  ;;  %v573_v34 = vsel %vm564_vm0, %v571_v23, %v572_v26  ;;  %v370_v35 = vor.u32 %v369_v28, %v365_v25  ;;  %v384_v41 = vshll.u32 %v1791_v33, 16  ;;  %v2090_v14 = vld [vmem:[%s1987_s27 + $0x48] sm:$0xff]   ;;  %v1797_v16 = vld [vmem:[%s1987_s27 + $0x50] ss:$0 sps:$4 sm:$0x11]   ;;  %v2103_v23 = vld [vmem:[%s1987_s27 + $0x54] sm:$0xff]  }
  0x24   : > { %532 = vrot.lane.b32.xlu0 %v351_v31, %s1906_s3  ;;  %v363_v32 = vsel %vm339_vm1, %v358_v27, %v362_v24  ;;  %v374_v36 = vrot.slane %v372_v29, 1  ;;  %v381_v40 = vrot.slane %v379_v37, 1  ;;  %v574_v47 = vrot.slane %v2019_v30, 1  ;;  %v1799_v27 = vld [vmem:[%s1987_s27 + $0x5c] ss:$0 sps:$4 sm:$0x11]  }
  0x25   : > { %615 = vrot.lane.b32.xlu1 %v570_v11, %s1905_s30  ;;  %v386_v43 = vrot.slane %v384_v41, 1  ;;  %v575_v48 = vrot.slane %v1791_v33, 1  ;;  %v391_v53 = vshll.u32 %v2049_v49, 16  ;;  %v389_v55 = vshrl.u32 %v2049_v49, 16 }
  0x26   : > { %v375_v38 = vsel %vm339_vm1, %v370_v35, %v374_v36  ;;  %v382_v42 = vor.u32 %v381_v40, %v377_v39  ;;  %v396_v57 = vshll.u32 %v1793_v51, 16  ;;  %v577_v62 = vrot.slane %v2049_v49, 1  ;;  %v2128_v39 = vld [vmem:[%s1987_s27 + $0x60] sm:$0xff]   ;;  %v1801_v41 = vld [vmem:[%s1987_s27 + $0x68] ss:$0 sps:$4 sm:$0x11]  }
  0x27   : > { %v576_v52 = vsel %vm564_vm0, %v574_v47, %v575_v48  ;;  %v393_v56 = vrot.slane %v391_v53, 1  ;;  %v578_v63 = vrot.slane %v1793_v51, 1  ;;  %v403_v4 = vshll.u32 %v2065_v60, 16  ;;  %v2141_v48 = vld [vmem:[%s1987_s27 + $0x6c] sm:$0xff]  }
  0x28   : > { %534 = vrot.lane.b32.xlu0 %v363_v32, %s1906_s3  ;;  %v387_v45 = vsel %vm339_vm1, %v382_v42, %v386_v43  ;;  %v398_v59 = vrot.slane %v396_v57, 1  ;;  %v401_v6 = vshrl.u32 %v2065_v60, 16  ;;  %v408_v8 = vshll.u32 %v1795_v2, 16  ;;  %v1803_v53 = vld [vmem:[%s1987_s27 + $0x74] ss:$0 sps:$4 sm:$0x11]  }
  0x29   : > { %734 = vrot.lane.b32.xlu1 %v573_v34, %s1904_s29  ;;  %v394_v58 = vor.u32 %v393_v56, %v389_v55  ;;  %v579_v5 = vsel %vm564_vm0, %v577_v62, %v578_v63  ;;  %v405_v7 = vrot.slane %v403_v4, 1  ;;  %v580_v12 = vrot.slane %v2065_v60, 1 }
  0x2a   : > { %v410_v10 = vrot.slane %v408_v8, 1  ;;  %v581_v13 = vrot.slane %v1795_v2, 1  ;;  %v415_v17 = vshll.u32 %v2090_v14, 16  ;;  %v413_v18 = vshrl.u32 %v2090_v14, 16 }
  0x2b   : > { %v399_v61 = vsel %vm339_vm1, %v394_v58, %v398_v59  ;;  %v406_v9 = vor.u32 %v405_v7, %v401_v6  ;;  %v420_v20 = vshll.u32 %v1797_v16, 16  ;;  %v583_v25 = vrot.slane %v2090_v14, 1 }
  0x2c   : > { %697 = vrot.lane.b32.xlu0 %v363_v32, %s1907_s4  ;;  %v582_v15 = vsel %vm564_vm0, %v580_v12, %v581_v13  ;;  %v417_v19 = vrot.slane %v415_v17, 1  ;;  %v584_v26 = vrot.slane %v1797_v16, 1  ;;  %v427_v28 = vshll.u32 %v2103_v23, 16  ;;  %v1807_v13 = vld [vmem:[%s1987_s27 + $0x80] ss:$0 sps:$4 sm:$0x11]  }
  0x2d   : > { %699 = vrot.lane.b32.xlu1 %v375_v38, %s1907_s4  ;;  %v411_v11 = vsel %vm339_vm1, %v406_v9, %v410_v10  ;;  %v422_v22 = vrot.slane %v420_v20, 1  ;;  %v425_v31 = vshrl.u32 %v2103_v23, 16  ;;  %v432_v33 = vshll.u32 %v1799_v27, 16  ;;  %v2166_v9 = vld [vmem:[%s1987_s27 + $0x78] sm:$0xff]  }
  0x2e   : > { %v418_v21 = vor.u32 %v417_v19, %v413_v18  ;;  %v585_v29 = vsel %vm564_vm0, %v583_v25, %v584_v26  ;;  %v429_v32 = vrot.slane %v427_v28, 1  ;;  %v586_v37 = vrot.slane %v2103_v23, 1  ;;  %v2184_v28 = vld [vmem:[%s1987_s27 + $0x84] sm:$0xff]  }
  0x2f   : > { %v434_v35 = vrot.slane %v432_v33, 1  ;;  %v439_v42 = vshll.u32 %v2128_v39, 16  ;;  %v437_v43 = vshrl.u32 %v2128_v39, 16  ;;  %v589_v51 = vrot.slane %v2128_v39, 1 }
  0x30   : > { %769 = vrot.lane.b32.xlu0 %v1990_v0, %s1908_s7  ;;  %v423_v24 = vsel %vm339_vm1, %v418_v21, %v422_v22  ;;  %v451_v54 = vshll.u32 %v2141_v48, 16  ;;  %v449_v56 = vshrl.u32 %v2141_v48, 16  ;;  %v456_v58 = vshll.u32 %v1803_v53, 16 }
  0x31   : > { %771 = vrot.lane.b32.xlu1 %v2019_v30, %s1908_s7  ;;  %v441_v44 = vrot.slane %v439_v42, 1  ;;  %v592_v6 = vrot.slane %v2141_v48, 1  ;;  %v593_v7 = vrot.slane %v1803_v53, 1  ;;  %v461_v19 = vshrl.u32 %v2166_v9, 16 }
  0x32   : > { %v453_v57 = vrot.slane %v451_v54, 1  ;;  %v458_v63 = vrot.slane %v456_v58, 1  ;;  %v468_v21 = vshll.u32 %v1807_v13, 16  ;;  %v595_v33 = vrot.slane %v2166_v9, 1 }
  0x33   : > { %v442_v46 = vor.u32 %v441_v44, %v437_v43 }
  0x34   : > { %816 = vrot.lane.b32.xlu0 %v375_v38, %s1909_s16  ;;  %v454_v62 = vor.u32 %v453_v57, %v449_v56 }
  0x35   : > { %818 = vrot.lane.b32.xlu1 %v387_v45, %s1909_s16 }
  0x36   : > { %v459_v4 = vsel %vm339_vm1, %v454_v62, %v458_v63 }
  0x38   : > { %851 = vrot.lane.b32.xlu0 %v573_v34, %s1910_s23 }
  0x39   : > { %536 = vrot.lane.b32.xlu1 %v375_v38, %s1906_s3  ;;  %v587_v38 = vrot.slane %v1799_v27, 1 }
  0x3b   : > { %v588_v40 = vsel %vm564_vm0, %v586_v37, %v587_v38  ;;  %v1810_v38 = vld [vmem:[%s1987_s27 + $0x8c] ss:$0 sps:$4 sm:$0x11]  }
  0x3c   : > { %853 = vrot.lane.b32.xlu0 %v576_v52, %s1910_s23 }
  0x3d   : > { %538 = vrot.lane.b32.xlu1 %v387_v45, %s1906_s3 }
  0x40   : > { %617 = vrot.lane.b32.xlu0 %v573_v34, %s1905_s30  ;;  %v430_v34 = vor.u32 %v429_v32, %v425_v31 }
  0x41   : > { %619 = vrot.lane.b32.xlu1 %v576_v52, %s1905_s30 }
  0x42   : > { %v435_v36 = vsel %vm339_vm1, %v430_v34, %v434_v35  ;;  %v596_v34 = vrot.slane %v1807_v13, 1 }
  0x44   : > { %654 = vrot.lane.b32.xlu0 %v2019_v30, %s1903_s28 }
  0x45   : > { %656 = vrot.lane.b32.xlu1 %v2049_v49, %s1903_s28 }
  0x48   : > { %701 = vrot.lane.b32.xlu0 %v387_v45, %s1907_s4  ;;  %v444_v45 = vshll.u32 %v1801_v41, 16 }
  0x49   : > { %703 = vrot.lane.b32.xlu1 %v399_v61, %s1907_s4 }
  0x4a   : > { %v446_v47 = vrot.slane %v444_v45, 1  ;;  %v597_v45 = vsel %vm564_vm0, %v595_v33, %v596_v34 }
  0x4c   : > { %736 = vrot.lane.b32.xlu0 %v576_v52, %s1904_s29  ;;  %v447_v50 = vsel %vm339_vm1, %v442_v46, %v446_v47  ;;  %v590_v52 = vrot.slane %v1801_v41, 1 }
  0x4d   : > { %738 = vrot.lane.b32.xlu1 %v579_v5, %s1904_s29 }
  0x4e   : > { %v591_v55 = vsel %vm564_vm0, %v589_v51, %v590_v52  ;;  %v480_v52 = vshll.u32 %v1810_v38, 16 }
  0x50   : > { %773 = vrot.lane.b32.xlu0 %v2049_v49, %s1908_s7 }
  0x51   : > { %775 = vrot.lane.b32.xlu1 %v2065_v60, %s1908_s7 }
  0x54   : > { %820 = vrot.lane.b32.xlu0 %v399_v61, %s1909_s16 }
  0x55   : > { %822 = vrot.lane.b32.xlu1 %v411_v11, %s1909_s16 }
  0x58   : > { %855 = vrot.lane.b32.xlu0 %v579_v5, %s1910_s23 }
  0x59   : > { %540 = vrot.lane.b32.xlu1 %v399_v61, %s1906_s3 }
  0x5c   : > { %857 = vrot.lane.b32.xlu0 %v582_v15, %s1910_s23 }
  0x5d   : > { %542 = vrot.lane.b32.xlu1 %v411_v11, %s1906_s3 }
  0x60   : > { %621 = vrot.lane.b32.xlu0 %v579_v5, %s1905_s30 }
  0x61   : > { %623 = vrot.lane.b32.xlu1 %v582_v15, %s1905_s30 }
  0x64   : > { %658 = vrot.lane.b32.xlu0 %v2065_v60, %s1903_s28 }
  0x65   : > { %660 = vrot.lane.b32.xlu1 %v2090_v14, %s1903_s28 }
  0x68   : > { %705 = vrot.lane.b32.xlu0 %v411_v11, %s1907_s4  ;;  %v594_v11 = vsel %vm564_vm0, %v592_v6, %v593_v7  ;;  %v598_v6 = vrot.slane %v2184_v28, 1  ;;  %v599_v7 = vrot.slane %v1810_v38, 1 }
  0x69   : > { %707 = vrot.lane.b32.xlu1 %v423_v24, %s1907_s4 }
  0x6c   : > { %740 = vrot.lane.b32.xlu0 %v582_v15, %s1904_s29  ;;  %v463_v15 = vshll.u32 %v2166_v9, 16 }
  0x6d   : > { %742 = vrot.lane.b32.xlu1 %v585_v29, %s1904_s29 }
  0x6e   : > { %v465_v20 = vrot.slane %v463_v15, 1  ;;  %v1812_v15 = vld [vmem:[%s1987_s27 + $0x98] ss:$0 sps:$4 sm:$0x11]  }
  0x70   : > { %777 = vrot.lane.b32.xlu0 %v2090_v14, %s1908_s7  ;;  %v466_v27 = vor.u32 %v465_v20, %v461_v19 }
  0x71   : > { %779 = vrot.lane.b32.xlu1 %v2103_v23, %s1908_s7 }
  0x74   : > { %824 = vrot.lane.b32.xlu0 %v423_v24, %s1909_s16 }
  0x75   : > { %826 = vrot.lane.b32.xlu1 %v435_v36, %s1909_s16 }
  0x78   : > { %859 = vrot.lane.b32.xlu0 %v585_v29, %s1910_s23 }
  0x79   : > { %544 = vrot.lane.b32.xlu1 %v423_v24, %s1906_s3 }
  0x7c   : > { %861 = vrot.lane.b32.xlu0 %v588_v40, %s1910_s23 }
  0x7d   : > { %546 = vrot.lane.b32.xlu1 %v435_v36, %s1906_s3 }
  0x80   : > { %625 = vrot.lane.b32.xlu0 %v585_v29, %s1905_s30 }
  0x81   : > { %627 = vrot.lane.b32.xlu1 %v588_v40, %s1905_s30 }
  0x84   : > { %662 = vrot.lane.b32.xlu0 %v2103_v23, %s1903_s28 }
  0x85   : > { %664 = vrot.lane.b32.xlu1 %v2128_v39, %s1903_s28 }
  0x88   : > { %709 = vrot.lane.b32.xlu0 %v435_v36, %s1907_s4 }
  0x89   : > { %711 = vrot.lane.b32.xlu1 %v447_v50, %s1907_s4 }
  0x8c   : > { %744 = vrot.lane.b32.xlu0 %v588_v40, %s1904_s29  ;;  %v475_v40 = vshll.u32 %v2184_v28, 16 }
  0x8d   : > { %746 = vrot.lane.b32.xlu1 %v591_v55, %s1904_s29 }
  0x8e   : > { %v653_v59 = vpop.permute.xlu1 %652  ;;  %v651_v61 = vpop.permute.xlu0 %650  ;;  %v477_v51 = vrot.slane %v475_v40, 1 }
  0x90   : > { %781 = vrot.lane.b32.xlu0 %v2128_v39, %s1908_s7 }
  0x91   : > { %783 = vrot.lane.b32.xlu1 %v2141_v48, %s1908_s7 }
  0x92   : > { %v733_v2 = vpop.permute.xlu0 %732 }
  0x93   : > { %v614_v5 = vpop.permute.xlu1 %613 }
  0x94   : > { %828 = vrot.lane.b32.xlu0 %v447_v50, %s1909_s16 }
  0x95   : > { %830 = vrot.lane.b32.xlu1 %v459_v4, %s1909_s16 }
  0x96   : > { %v533_v8 = vpop.permute.xlu0 %532 }
  0x97   : > { %v616_v10 = vpop.permute.xlu1 %615  ;;  %v885_v17 = vsel %vm883_vm3, %v1999_v3, %v533_v8  ;;  %v470_v3 = vrot.slane %v468_v21, 1  ;;  %v492_v21 = vshll.u32 %v1812_v15, 16 }
  0x98   : > { %863 = vrot.lane.b32.xlu0 %v591_v55, %s1910_s23  ;;  %v918_v25 = vsel %vm916_vm4, %v885_v17, %v614_v5 }
  0x99   : > { %548 = vrot.lane.b32.xlu1 %v447_v50, %s1906_s3  ;;  %v951_v32 = vsel %vm949_vm5, %v918_v25, %v651_v61  ;;  %v471_v37 = vsel %vm339_vm1, %v466_v27, %v470_v3  ;;  %v473_v50 = vshrl.u32 %v2184_v28, 16  ;;  %v482_v61 = vrot.slane %v480_v52, 1  ;;  %v2237_v27 = vld [vmem:[%s1987_s27 + $0x9c] sm:$0xff]  }
  0x9a   : > { %v535_v12 = vpop.permute.xlu0 %534 }
  0x9b   : > { %v735_v16 = vpop.permute.xlu1 %734  ;;  %v887_v24 = vsel %vm883_vm3, %v1993_v1, %v535_v12  ;;  %v600_v12 = vsel %vm564_vm0, %v598_v6, %v599_v7  ;;  %v604_v6 = vrot.slane %v2237_v27, 1 }
  0x9c   : > { %865 = vrot.lane.b32.xlu0 %v594_v11, %s1910_s23  ;;  %v920_v29 = vsel %vm916_vm4, %v887_v24, %v616_v10  ;;  %v2224_v10 = vld [vmem:[%s1987_s27 + $0x90] sm:$0xff]  }
  0x9d   : > { %550 = vrot.lane.b32.xlu1 %v459_v4, %s1906_s3  ;;  %v953_v35 = vsel %vm949_vm5, %v920_v29, %v653_v59  ;;  %v478_v59 = vor.u32 %v477_v51, %v473_v50  ;;  %v485_v19 = vshrl.u32 %v2224_v10, 16 }
  0x9e   : > { %v698_v18 = vpop.permute.xlu0 %697 }
  0x9f   : > { %v700_v22 = vpop.permute.xlu1 %699  ;;  %v984_v1 = vsel %vm982_vm6, %v951_v32, %v698_v18  ;;  %v601_v32 = vrot.slane %v2224_v10, 1 }
  0xa0   : > { %629 = vrot.lane.b32.xlu0 %v591_v55, %s1905_s30  ;;  %v1017_v42 = vsel %vm1015_vm7, %v984_v1, %v733_v2  ;;  %v986_v43 = vsel %vm982_vm6, %v953_v35, %v700_v22  ;;  %v602_v1 = vrot.slane %v1812_v15, 1 }
  0xa1   : > { %631 = vrot.lane.b32.xlu1 %v594_v11, %s1905_s30  ;;  %v1019_v55 = vsel %vm1015_vm7, %v986_v43, %v735_v16  ;;  %v487_v16 = vshll.u32 %v2224_v10, 16 }
  0xa2   : > { %v770_v26 = vpop.permute.xlu0 %769 }
  0xa3   : > { %v772_v31 = vpop.permute.xlu1 %771  ;;  %v1050_v44 = vsel %vm1048_vm8, %v1017_v42, %v770_v26  ;;  %v489_v20 = vrot.slane %v487_v16, 1  ;;  %v494_v26 = vrot.slane %v492_v21, 1  ;;  %v1816_v16 = vld [vmem:[%s1987_s27 + $0xb0] ss:$0 sps:$4 sm:$0x11]  }
  0xa4   : > { %666 = vrot.lane.b32.xlu0 %v2141_v48, %s1903_s28  ;;  %v1052_v56 = vsel %vm1048_vm8, %v1019_v55, %v772_v31 }
  0xa5   : > { %668 = vrot.lane.b32.xlu1 %v2166_v9, %s1903_s28  ;;  %v490_v25 = vor.u32 %v489_v20, %v485_v19 }
  0xa6   : > { %v817_v36 = vpop.permute.xlu0 %816 }
  0xa7   : > { %v819_v41 = vpop.permute.xlu1 %818  ;;  %v1083_v46 = vsel %vm1081_vm9, %v1050_v44, %v817_v36  ;;  %v495_v35 = vsel %vm339_vm1, %v490_v25, %v494_v26  ;;  %v1814_v36 = vld [vmem:[%s1987_s27 + $0xa4] ss:$0 sps:$4 sm:$0x11]   ;;  %v603_v44 = vsel %vm564_vm0, %v601_v32, %v602_v1 }
  0xa8   : > { %713 = vrot.lane.b32.xlu0 %v459_v4, %s1907_s4  ;;  %v1085_v57 = vsel %vm1081_vm9, %v1052_v56, %v819_v41  ;;  %v483_v4 = vsel %vm339_vm1, %v478_v59, %v482_v61  ;;  %v504_v51 = vshll.u32 %v1814_v36, 16  ;;  %v605_v7 = vrot.slane %v1814_v36, 1 }
  0xa9   : > { %715 = vrot.lane.b32.xlu1 %v471_v37, %s1907_s4 }
  0xaa   : > { %v852_v47 = vpop.permute.xlu0 %851  ;;  %v506_v61 = vrot.slane %v504_v51, 1 }
  0xab   : > { %v537_v53 = vpop.permute.xlu1 %536  ;;  %v1116_v54 = vsel %vm1114_vm10, %v1083_v46, %v852_v47 }
  0xac   : > { %748 = vrot.lane.b32.xlu0 %v594_v11, %s1904_s29  ;;  %1680 = vmatprep.mubr.msk.bf16.mxu0 %vm1167_vm11, %v1116_v54  ;;  %v889_v29 = vsel %vm883_vm3, %v1990_v0, %v537_v53 }
  0xad   : > { %750 = vrot.lane.b32.xlu1 %v597_v45, %s1904_s29 }
  0xae   : > { %v854_v58 = vpop.permute.xlu0 %853 }
  0xaf   : > { %v539_v62 = vpop.permute.xlu1 %538  ;;  %v1118_v63 = vsel %vm1114_vm10, %v1085_v57, %v854_v58 }
  0xb0   : > { %785 = vrot.lane.b32.xlu0 %v2166_v9, %s1908_s7  ;;  %1681 = vmatmul.mubr.msk.bf16.vlgmr.msra.gmra.mrb[0].mxu0 %vm1167_vm11, %v1118_v63  ;;  %v891_v40 = vsel %vm883_vm3, %v2019_v30, %v539_v62 }
  0xb1   : > { %787 = vrot.lane.b32.xlu1 %v2184_v28, %s1908_s7 }
  0xb2   : > { %v618_v2 = vpop.permute.xlu0 %617 }
  0xb3   : > { %v620_v5 = vpop.permute.xlu1 %619  ;;  %v922_v31 = vsel %vm916_vm4, %v889_v29, %v618_v2  ;;  %v2295_v29 = vld [vmem:[%s1987_s27 + $0xb4] sm:$0xff]  }
  0xb4   : > { %832 = vrot.lane.b32.xlu0 %v471_v37, %s1909_s16  ;;  %v924_v42 = vsel %vm916_vm4, %v891_v40, %v620_v5 }
  0xb5   : > { %834 = vrot.lane.b32.xlu1 %v483_v4, %s1909_s16 }
  0xb6   : > { %v655_v8 = vpop.permute.xlu0 %654 }
  0xb7   : > { %v657_v11 = vpop.permute.xlu1 %656  ;;  %v955_v33 = vsel %vm949_vm5, %v922_v31, %v655_v8 }
  0xb8   : > { %867 = vrot.lane.b32.xlu0 %v597_v45, %s1910_s23  ;;  %v957_v46 = vsel %vm949_vm5, %v924_v42, %v657_v11  ;;  %v2282_v11 = vld [vmem:[%s1987_s27 + $0xa8] sm:$0xff]  }
  0xb9   : > { %552 = vrot.lane.b32.xlu1 %v471_v37, %s1906_s3  ;;  %v499_v37 = vshll.u32 %v2237_v27, 16  ;;  %v509_v20 = vshrl.u32 %v2282_v11, 16 }
  0xba   : > { %v702_v13 = vpop.permute.xlu0 %701 }
  0xbb   : > { %v704_v17 = vpop.permute.xlu1 %703  ;;  %v988_v0 = vsel %vm982_vm6, %v955_v33, %v702_v13  ;;  %v501_v30 = vrot.slane %v499_v37, 1  ;;  %v606_v13 = vsel %vm564_vm0, %v604_v6, %v605_v7  ;;  %v607_v33 = vrot.slane %v2282_v11, 1 }
  0xbc   : > { %869 = vrot.lane.b32.xlu0 %v600_v12, %s1910_s23  ;;  %v990_v52 = vsel %vm982_vm6, %v957_v46, %v704_v17  ;;  %v511_v17 = vshll.u32 %v2282_v11, 16  ;;  %v521_v46 = vshrl.u32 %v2295_v29, 16  ;;  %v610_v6 = vrot.slane %v2295_v29, 1 }
  0xbd   : > { %554 = vrot.lane.b32.xlu1 %v483_v4, %s1906_s3 }
  0xbe   : > { %v737_v18 = vpop.permute.xlu0 %736  ;;  %v513_v21 = vrot.slane %v511_v17, 1  ;;  %v1820_v17 = vld [vmem:[%s1987_s27 + $0xc8] ss:$0 sps:$4 sm:$0x11]  }
  0xbf   : > { %v739_v22 = vpop.permute.xlu1 %738  ;;  %v1021_v41 = vsel %vm1015_vm7, %v988_v0, %v737_v18  ;;  %v1818_v0 = vld [vmem:[%s1987_s27 + $0xbc] ss:$0 sps:$4 sm:$0x11]  }
  0xc0   : > { %633 = vrot.lane.b32.xlu0 %v597_v45, %s1905_s30  ;;  %v497_v45 = vshrl.u32 %v2237_v27, 16  ;;  %v1023_v55 = vsel %vm1015_vm7, %v990_v52, %v739_v22  ;;  %v516_v22 = vshll.u32 %v1816_v16, 16  ;;  %v514_v26 = vor.u32 %v513_v21, %v509_v20 }
  0xc1   : > { %635 = vrot.lane.b32.xlu1 %v600_v12, %s1905_s30  ;;  %v528_v51 = vshll.u32 %v1818_v0, 16  ;;  %v611_v7 = vrot.slane %v1818_v0, 1 }
  0xc2   : > { %v774_v24 = vpop.permute.xlu0 %773  ;;  %v502_v59 = vor.u32 %v501_v30, %v497_v45 }
  0xc3   : > { %v776_v3 = vpop.permute.xlu1 %775  ;;  %v1054_v43 = vsel %vm1048_vm8, %v1021_v41, %v774_v24 }
  0xc4   : > { %670 = vrot.lane.b32.xlu0 %v2184_v28, %s1903_s28  ;;  %v1056_v56 = vsel %vm1048_vm8, %v1023_v55, %v776_v3  ;;  %v518_v3 = vrot.slane %v516_v22, 1 }
  0xc5   : > { %672 = vrot.lane.b32.xlu1 %v2224_v10, %s1903_s28 }
  0xc6   : > { %v821_v34 = vpop.permute.xlu0 %820  ;;  %v519_v37 = vsel %vm339_vm1, %v514_v26, %v518_v3 }
  0xc7   : > { %v823_v38 = vpop.permute.xlu1 %822  ;;  %v1087_v47 = vsel %vm1081_vm9, %v1054_v43, %v821_v34  ;;  %v608_v34 = vrot.slane %v1816_v16, 1 }
  0xc8   : > { %717 = vrot.lane.b32.xlu0 %v483_v4, %s1907_s4  ;;  %v1089_v57 = vsel %vm1081_vm9, %v1056_v56, %v823_v38  ;;  %v507_v4 = vsel %vm339_vm1, %v502_v59, %v506_v61  ;;  %v523_v38 = vshll.u32 %v2295_v29, 16  ;;  %v530_v61 = vrot.slane %v528_v51, 1 }
  0xc9   : > { %719 = vrot.lane.b32.xlu1 %v495_v35, %s1907_s4  ;;  %v609_v45 = vsel %vm564_vm0, %v607_v33, %v608_v34 }
  0xca   : > { %v856_v50 = vpop.permute.xlu0 %855 }
  0xcb   : > { %v541_v53 = vpop.permute.xlu1 %540  ;;  %v1120_v54 = vsel %vm1114_vm10, %v1087_v47, %v856_v50 }
  0xcc   : > { %752 = vrot.lane.b32.xlu0 %v600_v12, %s1904_s29  ;;  %1684 = vmatprep.mubr.msk.bf16.mxu0 %vm1167_vm11, %v1120_v54  ;;  %v893_v32 = vsel %vm883_vm3, %v2049_v49, %v541_v53 }
  0xcd   : > { %754 = vrot.lane.b32.xlu1 %v603_v44, %s1904_s29 }
  0xce   : > { %v858_v58 = vpop.permute.xlu0 %857 }
  0xcf   : > { %v543_v62 = vpop.permute.xlu1 %542  ;;  %v1122_v63 = vsel %vm1114_vm10, %v1089_v57, %v858_v58 }
  0xd0   : > { %789 = vrot.lane.b32.xlu0 %v2224_v10, %s1908_s7  ;;  %1685 = vmatmul.mubr.msk.bf16.gmra.mrb[4].mxu0 %vm1167_vm11, %v1122_v63  ;;  %v895_v41 = vsel %vm883_vm3, %v2065_v60, %v543_v62  ;;  %v525_v60 = vrot.slane %v523_v38, 1 }
  0xd1   : > { %791 = vrot.lane.b32.xlu1 %v2237_v27, %s1908_s7 }
  0xd2   : > { %v622_v2 = vpop.permute.xlu0 %621  ;;  %v526_v59 = vor.u32 %v525_v60, %v521_v46 }
  0xd3   : > { %v624_v5 = vpop.permute.xlu1 %623  ;;  %v926_v1 = vsel %vm916_vm4, %v893_v32, %v622_v2  ;;  %v1821_v32 = vld [vmem:[%s1987_s27 + $0xcc] sm:$0xff]  }
  0xd4   : > { %836 = vrot.lane.b32.xlu0 %v495_v35, %s1909_s16  ;;  %v928_v43 = vsel %vm916_vm4, %v895_v41, %v624_v5 }
  0xd5   : > { %838 = vrot.lane.b32.xlu1 %v507_v4, %s1909_s16 }
  0xd6   : > { %v659_v8 = vpop.permute.xlu0 %658 }
  0xd7   : > { %v661_v12 = vpop.permute.xlu1 %660 }
  0xd8   : > { %871 = vrot.lane.b32.xlu0 %v603_v44, %s1910_s23  ;;  %v961_v47 = vsel %vm949_vm5, %v928_v43, %v661_v12  ;;  %v2340_v12 = vld [vmem:[%s1987_s27 + $0xc0] sm:$0xff]  }
  0xd9   : > { %556 = vrot.lane.b32.xlu1 %v495_v35, %s1906_s3  ;;  %v959_v35 = vsel %vm949_vm5, %v926_v1, %v659_v8  ;;  %v686_v21 = vshrl.u32 %v2340_v12, 16 }
  0xda   : > { %v706_v15 = vpop.permute.xlu0 %705 }
  0xdb   : > { %v708_v18 = vpop.permute.xlu1 %707  ;;  %v992_v49 = vsel %vm982_vm6, %v959_v35, %v706_v15  ;;  %v612_v15 = vsel %vm564_vm0, %v610_v6, %v611_v7  ;;  %v729_v35 = vrot.slane %v2340_v12, 1 }
  0xdc   : > { %873 = vrot.lane.b32.xlu0 %v606_v13, %s1910_s23  ;;  %v994_v52 = vsel %vm982_vm6, %v961_v47, %v708_v18  ;;  %v688_v18 = vshll.u32 %v2340_v12, 16  ;;  %v805_v47 = vshrl.u32 %v1821_v32, 16 }
  0xdd   : > { %558 = vrot.lane.b32.xlu1 %v507_v4, %s1906_s3 }
  0xde   : > { %v741_v19 = vpop.permute.xlu0 %740  ;;  %v690_v22 = vrot.slane %v688_v18, 1 }
  0xdf   : > { %v743_v24 = vpop.permute.xlu1 %742  ;;  %v1025_v42 = vsel %vm1015_vm7, %v992_v49, %v741_v19  ;;  %v1822_v49 = vld [vmem:[%s1987_s27 + $0xd4] ss:$0 sps:$4 sm:$0x11]   ;;  %s1652_s27 = sshll.u32 %s1893_s12, 5  ;;  %s1911_s12 = smov [#allocation2]  }
  0xe0   : > { %637 = vrot.lane.b32.xlu0 %v603_v44, %s1905_s30  ;;  %v1027_v55 = vsel %vm1015_vm7, %v994_v52, %v743_v24  ;;  %v693_v24 = vshll.u32 %v1820_v17, 16  ;;  %v691_v3 = vor.u32 %v690_v22, %v686_v21  ;;  %v849_v6 = vrot.slane %v1822_v49, 1  ;;  %s1827_s6 = sshll.u32 %s1911_s12, 4  ;;  %s1828_s6 = int_to_ptr.vmem [resolvable:$false] %s1827_s6 }
  0xe1   : > { %639 = vrot.lane.b32.xlu1 %v606_v13, %s1905_s30 }
  0xe2   : > { %v778_v25 = vpop.permute.xlu0 %777 }
  0xe3   : > { %v780_v31 = vpop.permute.xlu1 %779  ;;  %v1058_v44 = vsel %vm1048_vm8, %v1025_v42, %v778_v25 }
  0xe4   : > { %674 = vrot.lane.b32.xlu0 %v2237_v27, %s1903_s28  ;;  %v1060_v56 = vsel %vm1048_vm8, %v1027_v55, %v780_v31  ;;  %v695_v31 = vrot.slane %v693_v24, 1 }
  0xe5   : > { %676 = vrot.lane.b32.xlu1 %v2282_v11, %s1903_s28 }
  0xe6   : > { %v825_v36 = vpop.permute.xlu0 %824  ;;  %v696_v38 = vsel %vm339_vm1, %v691_v3, %v695_v31 }
  0xe7   : > { %v827_v40 = vpop.permute.xlu1 %826  ;;  %v1091_v50 = vsel %vm1081_vm9, %v1058_v44, %v825_v36  ;;  %v730_v36 = vrot.slane %v1820_v17, 1 }
  0xe8   : > { %721 = vrot.lane.b32.xlu0 %v507_v4, %s1907_s4  ;;  %v1093_v57 = vsel %vm1081_vm9, %v1060_v56, %v827_v40  ;;  %v531_v4 = vsel %vm339_vm1, %v526_v59, %v530_v61  ;;  %v807_v40 = vshll.u32 %v1821_v32, 16 }
  0xe9   : > { %723 = vrot.lane.b32.xlu1 %v519_v37, %s1907_s4  ;;  %v731_v46 = vsel %vm564_vm0, %v729_v35, %v730_v36 }
  0xea   : > { %v860_v30 = vpop.permute.xlu0 %859  ;;  %v809_v51 = vrot.slane %v807_v40, 1 }
  0xeb   : > { %v545_v53 = vpop.permute.xlu1 %544  ;;  %v1124_v54 = vsel %vm1114_vm10, %v1091_v50, %v860_v30 }
  0xec   : > { %756 = vrot.lane.b32.xlu0 %v606_v13, %s1904_s29  ;;  %1688 = vmatprep.mubr.msk.bf16.mxu0 %vm1167_vm11, %v1124_v54  ;;  %v897_v33 = vsel %vm883_vm3, %v2090_v14, %v545_v53  ;;  %v810_v59 = vor.u32 %v809_v51, %v805_v47 }
  0xed   : > { %758 = vrot.lane.b32.xlu1 %v609_v45, %s1904_s29 }
  0xee   : > { %v862_v58 = vpop.permute.xlu0 %861 }
  0xef   : > { %v547_v62 = vpop.permute.xlu1 %546  ;;  %v1126_v63 = vsel %vm1114_vm10, %v1093_v57, %v862_v58 }
  0xf0   : > { %793 = vrot.lane.b32.xlu0 %v2282_v11, %s1908_s7  ;;  %1689 = vmatmul.mubr.msk.bf16.gmra.mrb[8].mxu0 %vm1167_vm11, %v1126_v63  ;;  %v899_v42 = vsel %vm883_vm3, %v2103_v23, %v547_v62  ;;  %v812_v23 = vshll.u32 %v1822_v49, 16 }
  0xf1   : > { %795 = vrot.lane.b32.xlu1 %v2295_v29, %s1908_s7 }
  0xf2   : > { %v626_v2 = vpop.permute.xlu0 %625  ;;  %v814_v61 = vrot.slane %v812_v23, 1 }
  0xf3   : > { %v628_v5 = vpop.permute.xlu1 %627  ;;  %v930_v34 = vsel %vm916_vm4, %v897_v33, %v626_v2 }
  0xf4   : > { %840 = vrot.lane.b32.xlu0 %v519_v37, %s1909_s16  ;;  %v932_v44 = vsel %vm916_vm4, %v899_v42, %v628_v5  ;;  %v848_v5 = vrot.slane %v1821_v32, 1 }
  0xf5   : > { %842 = vrot.lane.b32.xlu1 %v531_v4, %s1909_s16 }
  0xf6   : > { %v663_v8 = vpop.permute.xlu0 %662 }
  0xf7   : > { %v665_v13 = vpop.permute.xlu1 %664 }
  0xf8   : > { %875 = vrot.lane.b32.xlu0 %v609_v45, %s1910_s23  ;;  %v965_v50 = vsel %vm949_vm5, %v932_v44, %v665_v13  ;;  %v850_v13 = vsel %vm564_vm0, %v848_v5, %v849_v6 }
  0xf9   : > { %560 = vrot.lane.b32.xlu1 %v519_v37, %s1906_s3  ;;  %v963_v37 = vsel %vm949_vm5, %v930_v34, %v663_v8 }
  0xfa   : > { %v710_v16 = vpop.permute.xlu0 %709 }
  0xfb   : > { %v712_v19 = vpop.permute.xlu1 %711  ;;  %v996_v14 = vsel %vm982_vm6, %v963_v37, %v710_v16 }
  0xfc   : > { %877 = vrot.lane.b32.xlu0 %v612_v15, %s1910_s23  ;;  %v998_v52 = vsel %vm982_vm6, %v965_v50, %v712_v19 }
  0xfd   : > { %562 = vrot.lane.b32.xlu1 %v531_v4, %s1906_s3  ;;  %s2541_s3 = scalar_lea.hbm %s2593_s2, %s1652_s27 }
  0xfe   : > { %v745_v20 = vpop.permute.xlu0 %744 }
  0xff   : > { %v747_v25 = vpop.permute.xlu1 %746  ;;  %v1029_v43 = vsel %vm1015_vm7, %v996_v14, %v745_v20 }
 0x100   : > { %641 = vrot.lane.b32.xlu0 %v609_v45, %s1905_s30  ;;  %v1031_v55 = vsel %vm1015_vm7, %v998_v52, %v747_v25 }
 0x101   : > { %643 = vrot.lane.b32.xlu1 %v612_v15, %s1905_s30 }
 0x102   : > { %v782_v26 = vpop.permute.xlu0 %781 }
 0x103   : > { %v784_v1 = vpop.permute.xlu1 %783  ;;  %v1062_v45 = vsel %vm1048_vm8, %v1029_v43, %v782_v26 }
 0x104   : > { %678 = vrot.lane.b32.xlu0 %v2295_v29, %s1903_s28  ;;  %v1064_v56 = vsel %vm1048_vm8, %v1031_v55, %v784_v1 }
 0x105   : > { %680 = vrot.lane.b32.xlu1 %v2340_v12, %s1903_s28  ;;  %s1521_s28 = sshll.u32 %s2523_s26, 4  ;;  %s2543_s28 = int_to_ptr.vmem [resolvable:$true] %s1521_s28 }
 0x106   : > { %v829_v0 = vpop.permute.xlu0 %828  ;;  %s1823_s5 = scalar_lea.vmem %s2543_s28, 32  ;;  %p1830_p1 = scmp.lt.s32.totalorder %s2543_s28, %s1828_s6 }
 0x107   : > { %v831_v41 = vpop.permute.xlu1 %830  ;;  %v1095_v30 = vsel %vm1081_vm9, %v1062_v45, %v829_v0  ;;  %p1824_p12 = scmp.ne.s32.totalorder %s2543_s28, %s1823_s5 }
 0x108   : > { %725 = vrot.lane.b32.xlu0 %v531_v4, %s1907_s4  ;;  %v1097_v57 = vsel %vm1081_vm9, %v1064_v56, %v831_v41  ;;  %v815_v4 = vsel %vm339_vm1, %v810_v59, %v814_v61 }
 0x109   : > { %727 = vrot.lane.b32.xlu1 %v696_v38, %s1907_s4  ;;  %s1507_s4 = scalar_lea.sflag [#allocation3], %s148_s24  ;;  %p1825_p13 = pnand %p1824_p12, %p1967_p4 }
 0x10a   : > { %v864_v60 = vpop.permute.xlu0 %863 }
 0x10b   : > { %v549_v53 = vpop.permute.xlu1 %548  ;;  %v1128_v54 = vsel %vm1114_vm10, %v1095_v30, %v864_v60  ;;  %p1826_p0 = pneg %p1825_p13 }
 0x10c   : > { %760 = vrot.lane.b32.xlu0 %v612_v15, %s1904_s29  ;;  %1692 = vmatprep.mubr.msk.bf16.mxu0 %vm1167_vm11, %v1128_v54  ;;  %v901_v21 = vsel %vm883_vm3, %v2128_v39, %v549_v53 }
 0x10d   : > { %762 = vrot.lane.b32.xlu1 %v731_v46, %s1904_s29 }
 0x10e   : > { %v866_v58 = vpop.permute.xlu0 %865 }
 0x10f   : > { %v551_v62 = vpop.permute.xlu1 %550  ;;  %v1130_v63 = vsel %vm1114_vm10, %v1097_v57, %v866_v58 }
 0x110   : > { %797 = vrot.lane.b32.xlu0 %v2340_v12, %s1908_s7  ;;  %1693 = vmatmul.mubr.msk.bf16.gmra.mrb[12].mxu0 %vm1167_vm11, %v1130_v63  ;;  %v903_v31 = vsel %vm883_vm3, %v2141_v48, %v551_v62 }
 0x111   : > { %799 = vrot.lane.b32.xlu1 %v1821_v32, %s1908_s7  ;;  %s1829_s7 = scalar_lea.vmem %s1828_s6, 64 }
 0x112   : > { %v630_v2 = vpop.permute.xlu0 %629  ;;  %p1831_p2 = scmp.lt.s32.totalorder %s1829_s7, %s1823_s5 }
 0x113   : > { %v632_v7 = vpop.permute.xlu1 %631  ;;  %v934_v22 = vsel %vm916_vm4, %v901_v21, %v630_v2 }
 0x114   : > { %844 = vrot.lane.b32.xlu0 %v696_v38, %s1909_s16  ;;  %v936_v1 = vsel %vm916_vm4, %v903_v31, %v632_v7  ;;  %p1832_p3 = por %p1831_p2, %p1830_p1 }
 0x115   : > { %846 = vrot.lane.b32.xlu1 %v815_v4, %s1909_s16 }
 0x116   : > { %v667_v8 = vpop.permute.xlu0 %666  ;;  %p1833_p5 = pnand %p1832_p3, %p1826_p0 }
 0x117   : > { %v669_v15 = vpop.permute.xlu1 %668  ;;  %v967_v24 = vsel %vm949_vm5, %v934_v22, %v667_v8 }
 0x118   : > { %879 = vrot.lane.b32.xlu0 %v731_v46, %s1910_s23  ;;  %v969_v34 = vsel %vm949_vm5, %v936_v1, %v669_v15 }
 0x119   : > { %881 = vrot.lane.b32.xlu1 %v850_v13, %s1910_s23 }
 0x11a   : > { %v714_v12 = vpop.permute.xlu0 %713 }
 0x11b   : > { %v716_v16 = vpop.permute.xlu1 %715  ;;  %v1000_v26 = vsel %vm982_vm6, %v967_v24, %v714_v12 }
 0x11c   : > { %v1002_v36 = vsel %vm982_vm6, %v969_v34, %v716_v16 }
 0x11e   : > { %v749_v17 = vpop.permute.xlu0 %748 }
 0x11f   : > { %v751_v18 = vpop.permute.xlu1 %750  ;;  %v1033_v32 = vsel %vm1015_vm7, %v1000_v26, %v749_v17 }
 0x120   : > { %v1035_v38 = vsel %vm1015_vm7, %v1002_v36, %v751_v18 }
 0x122   : > { %v786_v19 = vpop.permute.xlu0 %785 }
 0x123   : > { %v788_v20 = vpop.permute.xlu1 %787  ;;  %v1066_v33 = vsel %vm1048_vm8, %v1033_v32, %v786_v19 }
 0x124   : > { %v1068_v48 = vsel %vm1048_vm8, %v1035_v38, %v788_v20 }
 0x126   : > { %v833_v25 = vpop.permute.xlu0 %832 }
 0x127   : > { %v835_v3 = vpop.permute.xlu1 %834  ;;  %v1099_v39 = vsel %vm1081_vm9, %v1066_v33, %v833_v25 }
 0x128   : > { %v1101_v49 = vsel %vm1081_vm9, %v1068_v48, %v835_v3 }
 0x12a   : > { %v868_v35 = vpop.permute.xlu0 %867 }
 0x12b   : > { %v553_v37 = vpop.permute.xlu1 %552  ;;  %v1132_v0 = vsel %vm1114_vm10, %v1099_v39, %v868_v35 }
 0x12c   : > { %1696 = vmatprep.mubr.msk.bf16.mxu1 %vm1167_vm11, %v1132_v0  ;;  %v905_v23 = vsel %vm883_vm3, %v2166_v9, %v553_v37 }
 0x12e   : > { %v870_v40 = vpop.permute.xlu0 %869 }
 0x12f   : > { %v555_v14 = vpop.permute.xlu1 %554  ;;  %v1134_v41 = vsel %vm1114_vm10, %v1101_v49, %v870_v40 }
 0x130   : > { %1697 = vmatmul.mubr.msk.bf16.vlgmr.msra.gmra.mrb[0].mxu1 %vm1167_vm11, %v1134_v41  ;;  %v907_v57 = vsel %vm883_vm3, %v2184_v28, %v555_v14 }
 0x132   : > { %v634_v42 = vpop.permute.xlu0 %633 }
 0x133   : > { %v636_v43 = vpop.permute.xlu1 %635  ;;  %v938_v52 = vsel %vm916_vm4, %v905_v23, %v634_v42 }
 0x134   : > { %v940_v59 = vsel %vm916_vm4, %v907_v57, %v636_v43 }
 0x136   : > { %v671_v44 = vpop.permute.xlu0 %670 }
 0x137   : > { %v673_v45 = vpop.permute.xlu1 %672  ;;  %v971_v53 = vsel %vm949_vm5, %v938_v52, %v671_v44 }
 0x138   : > { %v973_v62 = vsel %vm949_vm5, %v940_v59, %v673_v45 }
 0x13a   : > { %v718_v46 = vpop.permute.xlu0 %717 }
 0x13b   : > { %v720_v47 = vpop.permute.xlu1 %719  ;;  %v1004_v55 = vsel %vm982_vm6, %v971_v53, %v718_v46 }
 0x13c   : > { %v1006_v2 = vsel %vm982_vm6, %v973_v62, %v720_v47 }
 0x13e   : > { %v753_v50 = vpop.permute.xlu0 %752 }
 0x13f   : > { %v755_v30 = vpop.permute.xlu1 %754  ;;  %v1037_v58 = vsel %vm1015_vm7, %v1004_v55, %v753_v50 }
 0x140   : > { %v1039_v6 = vsel %vm1015_vm7, %v1006_v2, %v755_v30 }
 0x142   : > { %v790_v60 = vpop.permute.xlu0 %789 }
 0x143   : > { %v792_v51 = vpop.permute.xlu1 %791  ;;  %v1070_v61 = vsel %vm1048_vm8, %v1037_v58, %v790_v60 }
 0x144   : > { %v1072_v28 = vsel %vm1048_vm8, %v1039_v6, %v792_v51 }
 0x146   : > { %v837_v54 = vpop.permute.xlu0 %836 }
 0x147   : > { %v839_v56 = vpop.permute.xlu1 %838  ;;  %v1103_v9 = vsel %vm1081_vm9, %v1070_v61, %v837_v54 }
 0x148   : > { %v1105_v7 = vsel %vm1081_vm9, %v1072_v28, %v839_v56 }
 0x14a   : > { %v872_v63 = vpop.permute.xlu0 %871 }
 0x14b   : > { %v557_v4 = vpop.permute.xlu1 %556  ;;  %v1136_v5 = vsel %vm1114_vm10, %v1103_v9, %v872_v63 }
 0x14c   : > { %1700 = vmatprep.mubr.msk.bf16.mxu1 %vm1167_vm11, %v1136_v5  ;;  %v909_v26 = vsel %vm883_vm3, %v2224_v10, %v557_v4 }
 0x14e   : > { %v874_v8 = vpop.permute.xlu0 %873 }
 0x14f   : > { %v559_v13 = vpop.permute.xlu1 %558  ;;  %v1138_v15 = vsel %vm1114_vm10, %v1105_v7, %v874_v8 }
 0x150   : > { %1701 = vmatmul.mubr.msk.bf16.gmra.mrb[4].mxu1 %vm1167_vm11, %v1138_v15  ;;  %v911_v34 = vsel %vm883_vm3, %v2237_v27, %v559_v13 }
 0x152   : > { %v638_v12 = vpop.permute.xlu0 %637 }
 0x153   : > { %v640_v16 = vpop.permute.xlu1 %639  ;;  %v942_v3 = vsel %vm916_vm4, %v909_v26, %v638_v12 }
 0x154   : > { %v944_v35 = vsel %vm916_vm4, %v911_v34, %v640_v16 }
 0x156   : > { %v675_v17 = vpop.permute.xlu0 %674 }
 0x157   : > { %v677_v18 = vpop.permute.xlu1 %676  ;;  %v975_v31 = vsel %vm949_vm5, %v942_v3, %v675_v17 }
 0x158   : > { %v977_v37 = vsel %vm949_vm5, %v944_v35, %v677_v18 }
 0x15a   : > { %v722_v19 = vpop.permute.xlu0 %721 }
 0x15b   : > { %v724_v20 = vpop.permute.xlu1 %723  ;;  %v1008_v1 = vsel %vm982_vm6, %v975_v31, %v722_v19 }
 0x15c   : > { %v1010_v38 = vsel %vm982_vm6, %v977_v37, %v724_v20 }
 0x15e   : > { %v757_v21 = vpop.permute.xlu0 %756 }
 0x15f   : > { %v759_v22 = vpop.permute.xlu1 %758  ;;  %v1041_v39 = vsel %vm1015_vm7, %v1008_v1, %v757_v21 }
 0x160   : > { %v1043_v40 = vsel %vm1015_vm7, %v1010_v38, %v759_v22 }
 0x162   : > { %v794_v24 = vpop.permute.xlu0 %793 }
 0x163   : > { %v796_v25 = vpop.permute.xlu1 %795  ;;  %v1074_v36 = vsel %vm1048_vm8, %v1041_v39, %v794_v24 }
 0x164   : > { %v1076_v27 = vsel %vm1048_vm8, %v1043_v40, %v796_v25 }
 0x166   : > { %v841_v32 = vpop.permute.xlu0 %840 }
 0x167   : > { %v843_v33 = vpop.permute.xlu1 %842  ;;  %v1107_v10 = vsel %vm1081_vm9, %v1074_v36, %v841_v32 }
 0x168   : > { %v1109_v14 = vsel %vm1081_vm9, %v1076_v27, %v843_v33 }
 0x16a   : > { %v876_v0 = vpop.permute.xlu0 %875 }
 0x16b   : > { %v561_v48 = vpop.permute.xlu1 %560  ;;  %v1140_v49 = vsel %vm1114_vm10, %v1107_v10, %v876_v0 }
 0x16c   : > { %1704 = vmatprep.mubr.msk.bf16.mxu1 %vm1167_vm11, %v1140_v49  ;;  %v913_v54 = vsel %vm883_vm3, %v2282_v11, %v561_v48 }
 0x16e   : > { %v878_v41 = vpop.permute.xlu0 %877 }
 0x16f   : > { %v563_v42 = vpop.permute.xlu1 %562  ;;  %v1142_v43 = vsel %vm1114_vm10, %v1109_v14, %v878_v41 }
 0x170   : > { %1705 = vmatmul.mubr.msk.bf16.gmra.mrb[8].mxu1 %vm1167_vm11, %v1142_v43  ;;  %v915_v56 = vsel %vm883_vm3, %v2295_v29, %v563_v42 }
 0x172   : > { %v642_v44 = vpop.permute.xlu0 %641 }
 0x173   : > { %v644_v45 = vpop.permute.xlu1 %643  ;;  %v946_v57 = vsel %vm916_vm4, %v913_v54, %v642_v44 }
 0x174   : > { %v948_v59 = vsel %vm916_vm4, %v915_v56, %v644_v45 }
 0x176   : > { %v679_v46 = vpop.permute.xlu0 %678 }
 0x177   : > { %v681_v47 = vpop.permute.xlu1 %680  ;;  %v979_v61 = vsel %vm949_vm5, %v946_v57, %v679_v46 }
 0x178   : > { %v981_v63 = vsel %vm949_vm5, %v948_v59, %v681_v47 }
 0x17a   : > { %v726_v50 = vpop.permute.xlu0 %725 }
 0x17b   : > { %v728_v30 = vpop.permute.xlu1 %727  ;;  %v1012_v11 = vsel %vm982_vm6, %v979_v61, %v726_v50 }
 0x17c   : > { %v1014_v29 = vsel %vm982_vm6, %v981_v63, %v728_v30 }
 0x17e   : > { %v761_v60 = vpop.permute.xlu0 %760 }
 0x17f   : > { %v763_v51 = vpop.permute.xlu1 %762  ;;  %v1045_v5 = vsel %vm1015_vm7, %v1012_v11, %v761_v60 }
 0x180   : > { %v1047_v6 = vsel %vm1015_vm7, %v1014_v29, %v763_v51 }
 0x182   : > { %v798_v23 = vpop.permute.xlu0 %797 }
 0x183   : > { %v800_v52 = vpop.permute.xlu1 %799  ;;  %v2454_v53 = vpop.f32.mrb[0].mxu0  ;;  %v1078_v28 = vsel %vm1048_vm8, %v1045_v5, %v798_v23 }
 0x184   : > { %v2458_v55 = vpop.f32.mrb[1].mxu0  ;;  %v1080_v8 = vsel %vm1048_vm8, %v1047_v6, %v800_v52 }
 0x185   : > { %v2463_v58 = vpop.f32.mrb[2].mxu0 }
 0x186   : > { %v2467_v62 = vpop.f32.mrb[3].mxu0  ;;  %v845_v9 = vpop.permute.xlu0 %844 }
 0x187   : > { %v847_v2 = vpop.permute.xlu1 %846  ;;  %v1365_v4 = vadd.f32 %v2467_v62, %v2458_v55  ;;  %v1111_v13 = vsel %vm1081_vm9, %v1078_v28, %v845_v9 }
 0x188   : > { %v1113_v12 = vsel %vm1081_vm9, %v1080_v8, %v847_v2 }
 0x189   : > { %v1366_v7 = vadd.f32 %v2454_v53, %v1365_v4 }
 0x18a   : > { %v880_v15 = vpop.permute.xlu0 %879 }
 0x18b   : > { %v882_v16 = vpop.permute.xlu1 %881  ;;  %v1144_v17 = vsel %vm1114_vm10, %v1111_v13, %v880_v15  ;;  %v1367_v18 = vadd.f32 %v2463_v58, %v1366_v7 }
 0x18c   : > { %v1146_v19 = vsel %vm1114_vm10, %v1113_v12, %v882_v16  ;;  %1708 = vmatprep.mubr.msk.bf16.mxu1 %vm1167_vm11, %v1144_v17 }
 0x18d   : > { %1709 = vmatmul.mubr.msk.bf16.gmra.mrb[12].mxu1 %vm1167_vm11, %v1146_v19 }
 0x1a3   : > { %v2486_v20 = vpop.f32.mrb[4].mxu0 }
 0x1a4   : > { %v2488_v21 = vpop.f32.mrb[5].mxu0 }
 0x1a5   : > { %v1368_v22 = vadd.f32 %v1367_v18, %v2488_v21  ;;  %v2491_v24 = vpop.f32.mrb[6].mxu0 }
 0x1a6   : > { %v2493_v25 = vpop.f32.mrb[7].mxu0 }
 0x1a7   : > { %v1369_v26 = vadd.f32 %v1368_v22, %v2493_v25 }
 0x1a9   : > { %v1370_v3 = vadd.f32 %v2486_v20, %v1369_v26 }
 0x1ab   : > { %v1371_v31 = vadd.f32 %v2491_v24, %v1370_v3 }
 0x1c3   : > { %v2498_v32 = vpop.f32.mrb[8].mxu0 }
 0x1c4   : > { %v2500_v1 = vpop.f32.mrb[9].mxu0 }
 0x1c5   : > { %v1372_v33 = vadd.f32 %v1371_v31, %v2500_v1  ;;  %v2503_v34 = vpop.f32.mrb[10].mxu0 }
 0x1c6   : > { %v2505_v39 = vpop.f32.mrb[11].mxu0 }
 0x1c7   : > { %v1373_v35 = vadd.f32 %v1372_v33, %v2505_v39 }
 0x1c9   : > { %v1374_v36 = vadd.f32 %v2498_v32, %v1373_v35 }
 0x1cb   : > { %v1375_v37 = vadd.f32 %v2503_v34, %v1374_v36 }
 0x1e3   : > { %v2510_v10 = vpop.f32.mrb[12].mxu0 }
 0x1e4   : > { %v1286_v0 = vpop.f32.mrb[13].mxu0 }
 0x1e5   : > { %v1376_v38 = vadd.f32 %v1375_v37, %v1286_v0  ;;  %v2512_v48 = vpop.f32.mrb[14].mxu0 }
 0x1e6   : > { %v1289_v49 = vpop.f32.mrb[15].mxu0 }
 0x1e7   : > { %v1377_v40 = vadd.f32 %v1376_v38, %v1289_v49 }
 0x1e9   : > { %v1378_v27 = vadd.f32 %v2510_v10, %v1377_v40 }
 0x1eb   : > { %v1379_v14 = vadd.f32 %v2512_v48, %v1378_v27 }
 0x203   : > { %v1698_v41 = vpop.f32.mrb[0].mxu1 }
 0x204   : > { %v1302_v42 = vpop.f32.mrb[1].mxu1 }
 0x205   : > { %v1380_v43 = vadd.f32 %v1379_v14, %v1302_v42  ;;  %v1699_v44 = vpop.f32.mrb[2].mxu1 }
 0x206   : > { %v1305_v45 = vpop.f32.mrb[3].mxu1 }
 0x207   : > { %v1381_v46 = vadd.f32 %v1380_v43, %v1305_v45 }
 0x209   : > { %v1382_v47 = vadd.f32 %v1698_v41, %v1381_v46 }
 0x20b   : > { %v1383_v50 = vadd.f32 %v1699_v44, %v1382_v47 }
 0x223   : > { %v1702_v30 = vpop.f32.mrb[4].mxu1 }
 0x224   : > { %v1318_v60 = vpop.f32.mrb[5].mxu1 }
 0x225   : > { %v1384_v51 = vadd.f32 %v1383_v50, %v1318_v60  ;;  %v1703_v23 = vpop.f32.mrb[6].mxu1 }
 0x226   : > { %v1321_v52 = vpop.f32.mrb[7].mxu1 }
 0x227   : > { %v1385_v54 = vadd.f32 %v1384_v51, %v1321_v52 }
 0x229   : > { %v1386_v56 = vadd.f32 %v1702_v30, %v1385_v54 }
 0x22b   : > { %v1387_v57 = vadd.f32 %v1703_v23, %v1386_v56 }
 0x243   : > { %v1706_v59 = vpop.f32.mrb[8].mxu1 }
 0x244   : > { %v1334_v61 = vpop.f32.mrb[9].mxu1 }
 0x245   : > { %v1388_v9 = vadd.f32 %v1387_v57, %v1334_v61  ;;  %v1707_v63 = vpop.f32.mrb[10].mxu1 }
 0x246   : > { %v1337_v11 = vpop.f32.mrb[11].mxu1 }
 0x247   : > { %v1389_v2 = vadd.f32 %v1388_v9, %v1337_v11 }
 0x249   : > { %v1390_v4 = vadd.f32 %v1706_v59, %v1389_v2 }
 0x24b   : > { %v1391_v29 = vadd.f32 %v1707_v63, %v1390_v4 }
 0x260   : > { %v1710_v5 = vpop.f32.mrb[12].mxu1 }
 0x261   : > { %v1350_v6 = vpop.f32.mrb[13].mxu1 }
 0x262   : > { %v1392_v28 = vadd.f32 %v1391_v29, %v1350_v6  ;;  %v1711_v7 = vpop.f32.mrb[14].mxu1 }
 0x263   : > { %v1353_v8 = vpop.f32.mrb[15].mxu1 }
 0x264   : > { %v1393_v13 = vadd.f32 %v1392_v28, %v1353_v8 }
 0x266   : > { %v1394_v15 = vadd.f32 %v1710_v5, %v1393_v13 }
 0x268   : > { %v1395_v12 = vadd.f32 %v1711_v7, %v1394_v15 }
 0x26a   : > { %v1396_v16 = vrot.slane %v1395_v12, 4 }
 0x26c   : > { %v1397_v17 = vadd.f32 %v1396_v16, %v1395_v12 }
 0x26e   : > { %v1398_v18 = vrot.slane %v1397_v17, 2 }
 0x270   : > { %v1399_v19 = vadd.f32 %v1398_v18, %v1397_v17 }
 0x272   : > { %v1400_v22 = vrot.slane %v1399_v19, 1 }
 0x274   : > { %v1401_v26 = vadd.f32 %v1400_v22, %v1399_v19 }
 0x276   : > { %v1402_v3 = vmul.f32 0.00390625, %v1401_v26 }
 0x278   : > { %v1403_v31 = vsub.f32 %v2458_v55, %v1402_v3  ;;  %v1404_v33 = vsub.f32 %v2467_v62, %v1402_v3  ;;  %v1405_v35 = vsub.f32 %v2454_v53, %v1402_v3  ;;  %v1406_v36 = vsub.f32 %v2463_v58, %v1402_v3  ;;  %1504 = vst [vmem:[%s2523_s26] sm:$0x1] %v1402_v3 }
 0x279   : > { %v1407_v37 = vsub.f32 %v2488_v21, %v1402_v3  ;;  %v1408_v38 = vsub.f32 %v2493_v25, %v1402_v3  ;;  %v1409_v40 = vsub.f32 %v2486_v20, %v1402_v3  ;;  %v1410_v27 = vsub.f32 %v2491_v24, %v1402_v3 }
 0x27a   : > { %v1411_v55 = vsub.f32 %v2500_v1, %v1402_v3  ;;  %v1412_v62 = vsub.f32 %v2505_v39, %v1402_v3  ;;  %v1413_v53 = vsub.f32 %v2498_v32, %v1402_v3  ;;  %v1414_v58 = vsub.f32 %v2503_v34, %v1402_v3 }
 0x27b   : > { %v1415_v14 = vsub.f32 %v1286_v0, %v1402_v3  ;;  %v1416_v43 = vsub.f32 %v1289_v49, %v1402_v3  ;;  %v1417_v46 = vsub.f32 %v2510_v10, %v1402_v3  ;;  %v1418_v21 = vsub.f32 %v2512_v48, %v1402_v3 }
 0x27c   : > { %v1419_v47 = vsub.f32 %v1302_v42, %v1402_v3  ;;  %v1420_v25 = vsub.f32 %v1305_v45, %v1402_v3  ;;  %v1421_v50 = vsub.f32 %v1698_v41, %v1402_v3  ;;  %v1422_v20 = vsub.f32 %v1699_v44, %v1402_v3 }
 0x27d   : > { %v1423_v51 = vsub.f32 %v1318_v60, %v1402_v3  ;;  %v1424_v24 = vsub.f32 %v1321_v52, %v1402_v3  ;;  %v1425_v54 = vsub.f32 %v1702_v30, %v1402_v3  ;;  %v1426_v1 = vsub.f32 %v1703_v23, %v1402_v3 }
 0x27e   : > { %v1427_v56 = vsub.f32 %v1334_v61, %v1402_v3  ;;  %v1428_v39 = vsub.f32 %v1337_v11, %v1402_v3  ;;  %v1429_v57 = vsub.f32 %v1706_v59, %v1402_v3  ;;  %v1430_v32 = vsub.f32 %v1707_v63, %v1402_v3 }
 0x27f   : > { %v1431_v9 = vsub.f32 %v1350_v6, %v1402_v3  ;;  %v1432_v34 = vsub.f32 %v1353_v8, %v1402_v3  ;;  %v1433_v0 = vsub.f32 %v1710_v5, %v1402_v3  ;;  %v1434_v49 = vsub.f32 %v1711_v7, %v1402_v3 }
 0x280   : > { %v1435_v2 = vmul.f32 %v1403_v31, %v1403_v31  ;;  %v1436_v10 = vmul.f32 %v1404_v33, %v1404_v33  ;;  %v1437_v4 = vmul.f32 %v1405_v35, %v1405_v35  ;;  %v1438_v42 = vmul.f32 %v1406_v36, %v1406_v36 }
 0x281   : > { %v1439_v41 = vmul.f32 %v1407_v37, %v1407_v37  ;;  %v1440_v60 = vmul.f32 %v1408_v38, %v1408_v38  ;;  %v1441_v30 = vmul.f32 %v1409_v40, %v1409_v40  ;;  %v1442_v61 = vmul.f32 %v1410_v27, %v1410_v27 }
 0x282   : > { %v1467_v48 = vadd.f32 %v1436_v10, %v1435_v2  ;;  %v1443_v59 = vmul.f32 %v1411_v55, %v1411_v55  ;;  %v1444_v29 = vmul.f32 %v1412_v62, %v1412_v62  ;;  %v1445_v5 = vmul.f32 %v1413_v53, %v1413_v53 }
 0x283   : > { %v1446_v7 = vmul.f32 %v1414_v58, %v1414_v58  ;;  %v1447_v13 = vmul.f32 %v1415_v14, %v1415_v14  ;;  %v1448_v12 = vmul.f32 %v1416_v43, %v1416_v43  ;;  %v1449_v17 = vmul.f32 %v1417_v46, %v1417_v46 }
 0x284   : > { %v1468_v45 = vadd.f32 %v1467_v48, %v1437_v4  ;;  %v1450_v19 = vmul.f32 %v1418_v21, %v1418_v21  ;;  %v1451_v26 = vmul.f32 %v1419_v47, %v1419_v47  ;;  %v1452_v31 = vmul.f32 %v1420_v25, %v1420_v25 }
 0x285   : > { %v1453_v35 = vmul.f32 %v1421_v50, %v1421_v50  ;;  %v1454_v37 = vmul.f32 %v1422_v20, %v1422_v20  ;;  %v1455_v40 = vmul.f32 %v1423_v51, %v1423_v51  ;;  %v1456_v55 = vmul.f32 %v1424_v24, %v1424_v24 }
 0x286   : > { %v1469_v44 = vadd.f32 %v1468_v45, %v1438_v42  ;;  %v1457_v53 = vmul.f32 %v1425_v54, %v1425_v54  ;;  %v1458_v14 = vmul.f32 %v1426_v1, %v1426_v1  ;;  %v1459_v46 = vmul.f32 %v1427_v56, %v1427_v56 }
 0x287   : > { %v1460_v21 = vmul.f32 %v1428_v39, %v1428_v39  ;;  %v1461_v47 = vmul.f32 %v1429_v57, %v1429_v57  ;;  %v1462_v25 = vmul.f32 %v1430_v32, %v1430_v32  ;;  %v1463_v20 = vmul.f32 %v1431_v9, %v1431_v9 }
 0x288   : > { %v1470_v52 = vadd.f32 %v1469_v44, %v1439_v41  ;;  %v1464_v51 = vmul.f32 %v1432_v34, %v1432_v34  ;;  %v1465_v24 = vmul.f32 %v1433_v0, %v1433_v0  ;;  %v1466_v1 = vmul.f32 %v1434_v49, %v1434_v49 }
 0x28a   : > { %v1471_v23 = vadd.f32 %v1470_v52, %v1440_v60 }
 0x28c   : > { %v1472_v11 = vadd.f32 %v1471_v23, %v1441_v30 }
 0x28e   : > { %v1473_v63 = vadd.f32 %v1472_v11, %v1442_v61 }
 0x290   : > { %v1474_v6 = vadd.f32 %v1473_v63, %v1443_v59 }
 0x292   : > { %v1475_v28 = vadd.f32 %v1474_v6, %v1444_v29 }
 0x294   : > { %v1476_v8 = vadd.f32 %v1475_v28, %v1445_v5 }
 0x296   : > { %v1477_v15 = vadd.f32 %v1476_v8, %v1446_v7 }
 0x298   : > { %v1478_v16 = vadd.f32 %v1477_v15, %v1447_v13 }
 0x29a   : > { %v1479_v18 = vadd.f32 %v1478_v16, %v1448_v12 }
 0x29c   : > { %v1480_v22 = vadd.f32 %v1479_v18, %v1449_v17 }
 0x29e   : > { %v1481_v3 = vadd.f32 %v1480_v22, %v1450_v19 }
 0x2a0   : > { %v1482_v33 = vadd.f32 %v1481_v3, %v1451_v26 }
 0x2a2   : > { %v1483_v36 = vadd.f32 %v1482_v33, %v1452_v31 }
 0x2a4   : > { %v1484_v38 = vadd.f32 %v1483_v36, %v1453_v35 }
 0x2a6   : > { %v1485_v27 = vadd.f32 %v1484_v38, %v1454_v37 }
 0x2a8   : > { %v1486_v62 = vadd.f32 %v1485_v27, %v1455_v40 }
 0x2aa   : > { %v1487_v58 = vadd.f32 %v1486_v62, %v1456_v55 }
 0x2ac   : > { %v1488_v43 = vadd.f32 %v1487_v58, %v1457_v53 }
 0x2ae   : > { %v1489_v2 = vadd.f32 %v1488_v43, %v1458_v14 }
 0x2b0   : > { %v1490_v10 = vadd.f32 %v1489_v2, %v1459_v46 }
 0x2b2   : > { %v1491_v4 = vadd.f32 %v1490_v10, %v1460_v21 }
 0x2b4   : > { %v1492_v50 = vadd.f32 %v1491_v4, %v1461_v47 }
 0x2b6   : > { %v1493_v48 = vadd.f32 %v1492_v50, %v1462_v25 }
 0x2b8   : > { %v1494_v42 = vadd.f32 %v1493_v48, %v1463_v20 }
 0x2ba   : > { %v1495_v54 = vadd.f32 %v1494_v42, %v1464_v51 }
 0x2bc   : > { %v1496_v45 = vadd.f32 %v1495_v54, %v1465_v24 }
 0x2be   : > { %v1497_v56 = vadd.f32 %v1496_v45, %v1466_v1 }
 0x2c0   : > { %v1498_v39 = vrot.slane %v1497_v56, 4 }
 0x2c2   : > { %v1499_v41 = vadd.f32 %v1498_v39, %v1497_v56 }
 0x2c4   : > { %v1500_v57 = vrot.slane %v1499_v41, 2 }
 0x2c6   : > { %v1501_v44 = vadd.f32 %v1500_v57, %v1499_v41 }
 0x2c8   : > { %v1502_v32 = vrot.slane %v1501_v44, 1 }
 0x2ca   : > { %v1503_v60 = vadd.f32 %v1502_v32, %v1501_v44 }
 0x2cc   : > { %1505 = vst [vmem:[%s2523_s26 + $0x1] sm:$0x1] %v1503_v60 }
 0x2cd   : > { %1836 = shalt.err (!%p1833_p5)
}
 0x2ce   : > { %s1837_s8 = scalar_lea.hbm %s2541_s3, 32  ;;  %s1841_s18 = scalar_lea.hbm %s2593_s2, 64 }
 0x2cf   : > { %p1838_p6 = scmp.ne.s32.totalorder %s2541_s3, %s1837_s8  ;;  %p1842_p10 = scmp.lt.u32.totalorder %s2541_s3, %s2593_s2 }
 0x2d0   : > { %p1843_p11 = scmp.lt.u32.totalorder %s1841_s18, %s1837_s8  ;;  %p1845_p13 = scmp.lt.u32.totalorder %s1837_s8, %s2541_s3 }
 0x2d1   : > { %p1839_p7 = pnand %p1838_p6, %p1967_p4 }
 0x2d2   : > { %p1844_p12 = por %p1843_p11, %p1842_p10 }
 0x2d3   : > { %p1840_p9 = pneg %p1839_p7 }
 0x2d4   : > { %p1846_p0 = por %p1845_p13, %p1844_p12 }
 0x2d6   : > { %p1847_p1 = pnand %p1846_p0, %p1840_p9 }
 0x2d8   : > { %1850 = shalt.err (!%p1847_p1)
}
 0x2d9   : > { %1721 = dma.vmem_to_hbm [thread:$0]  (%p1967_p4), %s2543_s28, 32, %s2541_s3, %s1507_s4  }
 0x2da PF: > { %p1727_p2 = scmp.ge.s32.totalorder %s1901_s14, 2  ;;  %s1533_s24 = sand.u32 1, %s1881_s9  }
 0x2db   : > { %s1534_s25 = scalar_lea.sflag [#allocation3], %s1533_s24 }
 0x2dc   : > { %p1724_p3 = pnand %p1727_p2, %p1974_p8 }
 0x2de   : > { %1876 = dma.done.wait (!%p1724_p3), %s1534_s25, 32  }
 0x2df   : > { %1878 = vsyncadd (!%p1724_p3), %s1534_s25, 4294967264  ;;  %s15_s14 = sadd.s32 1, %s1901_s14   ;;  %s2596_s9 = smov %s1885_s10 }
 0x2e0   : > { %p12_p5 = scmp.ge.s32.totalorder %s15_s14, 4   ;;  %s2597_s10 = smov %s1889_s11 }
 0x2e1   : > { %s2598_s11 = smov %s1980_s22  ;;  %s2599_s12 = smov %s1897_s13 }
 0x2e2   : > { %s2600_s13 = smov %s2602_s17  ;;  %14 = sbr.rel (!%p12_p5) target bundleno = 4 (0x4), region = 63 }
 0x2e9   :  { %1539 = vsyncpa [#allocation3], 1 }
 0x2ea   :  { %1541 = vsyncpa [#allocation3 + $0x1], 1 }

</bundles_post_ra>
